<compile_context>
chip_gen: v7x
topology: tpu7x:2x2x1
jax: 0.10.0
libtpu: 0.0.40
codegen_flags: <defaults>
</compile_context>

<pallas_src>
import functools

import jax
import jax.numpy as jnp
from jax.experimental import pallas as pl
from jax.experimental.pallas import tpu as pltpu

_LANE = 128


def _co_attn_kernel(xflat_ref, xres_ref, wqkv_ref, bqkv_ref, wo_ref, bo_ref,
                    gamma_ref, beta_ref, out_ref, attn_scr,
                    *, num_heads, lane_blk, ln_eps):
    # xflat_ref: (bb, T, C*D)   rows (t), cols channel-major (c, d)
    # xres_ref : (bb, C, T, D)  original layout (residual + LayerNorm path)
    # wqkv_ref : (C*D, 3*H*LB)  block-diag per-channel Linear, q-scaling folded
    #                           in, each (q|k|v, head) slice zero-padded to LB
    # wo_ref   : (H*LB, D)      out_proj with rows padded to the same blocks
    # attn_scr : (bb*T, H*LB)   VMEM scratch for the merged head outputs
    bb, T, CD = xflat_ref.shape
    _, C, _, D = xres_ref.shape
    H = num_heads
    LB = lane_blk

    # ---- single fused QKV projection (one MXU op for all b, h, q/k/v) ----
    xf = xflat_ref[...].reshape(bb * T, CD)            # leading-dim merge: free
    qkv = jnp.dot(xf, wqkv_ref[...],
                  preferred_element_type=jnp.float32) + bqkv_ref[...]

    wo = wo_ref[...]
    bo = bo_ref[...]
    gamma = gamma_ref[...]
    beta = beta_ref[...]

    nt = (((1,), (1,)), ((), ()))        # q @ k^T without an explicit transpose

    # ---- attention: static unroll over (b, h); all slices are 128-lane aligned
    for b in range(bb):
        r0 = b * T
        for h in range(H):
            qh = qkv[r0:r0 + T, h * LB:(h + 1) * LB]                   # (T, LB)
            kh = qkv[r0:r0 + T, (H + h) * LB:(H + h + 1) * LB]
            vh = qkv[r0:r0 + T, (2 * H + h) * LB:(2 * H + h + 1) * LB]
            # zero-padded lanes of q/k contribute exact zeros to the contraction
            s = jax.lax.dot_general(qh, kh, nt,
                                    preferred_element_type=jnp.float32)  # (T,T)
            m = jnp.max(s, axis=-1, keepdims=True)
            e = jnp.exp(s - m)
            p = e / jnp.sum(e, axis=-1, keepdims=True)          # exact softmax
            # head output lands directly in its lane block of the merged buffer
            attn_scr[r0:r0 + T, h * LB:(h + 1) * LB] = jnp.dot(
                p, vh, preferred_element_type=jnp.float32)

    # ---- single out-projection dot over all (b, t) rows and all heads ----
    attn_out = jnp.dot(attn_scr[...], wo,
                       preferred_element_type=jnp.float32) + bo      # (bb*T, D)

    # ---- residual added TWICE (as in PyTorch), LayerNorm, mean over C ----
    z = attn_out.reshape(bb, 1, T, D) + 2.0 * xres_ref[...]          # (bb,C,T,D)
    mu = jnp.mean(z, axis=-1, keepdims=True)
    var = jnp.mean(jnp.square(z - mu), axis=-1, keepdims=True)
    zn = (z - mu) * jax.lax.rsqrt(var + ln_eps)
    out_ref[...] = jnp.mean(zn * gamma + beta, axis=1)        # one merged store


def co_attention_simple(x, params, num_heads, ln_eps=1e-5, b_block=None):
    """x: (B, C, T, D) float32. Returns (B, T, D)."""
    B, C, T, D = x.shape
    E = params['wq'].shape[1]
    Ef = C * E
    H = num_heads
    assert Ef % H == 0
    hd = Ef // H
    scaling = float(hd) ** -0.5
    LB = max(_LANE, ((hd + _LANE - 1) // _LANE) * _LANE)  # lane-aligned head blk

    # ---- one-time wrapper-side prep (plain XLA, outside the kernel) ----
    # Matmul-friendly layout: rows (b, t), cols channel-major (c, d).
    # x is also passed in its original layout for the residual/LN path; the
    # duplicate DMA bytes are negligible at these shapes.
    x_flat = jnp.transpose(x, (0, 2, 1, 3)).reshape(B, T, C * D)

    def block_diag_rep(w):
        # per-channel Linear + channel-major concat as one (C*D, C*E) weight.
        # NOTE: C^2-redundant; fine at C=8 — switch to a plain (D,3E) projection
        # with lane-blocked placement if C/D grow and this becomes MXU/VMEM-bound.
        d_, e_ = w.shape
        eye = jnp.eye(C, dtype=w.dtype)
        t = eye[:, :, None, None] * w[None, None, :, :]       # (C, C, D, E)
        return t.transpose(0, 2, 1, 3).reshape(C * d_, C * e_)

    def pad_cols(w, width):
        r, c = w.shape
        return w if c == width else jnp.concatenate(
            [w, jnp.zeros((r, width - c), w.dtype)], axis=1)

    def pad_rows(w, height):
        r, c = w.shape
        return w if r == height else jnp.concatenate(
            [w, jnp.zeros((height - r, c), w.dtype)], axis=0)

    # q scaling folded into weight AND bias: (x@Wq + bq)*s == x@(Wq*s) + (bq*s)
    wq_bd = block_diag_rep(params['wq']) * scaling
    wk_bd = block_diag_rep(params['wk'])
    wv_bd = block_diag_rep(params['wv'])
    bq_t = jnp.tile(params['bq'], (1, C)) * scaling
    bk_t = jnp.tile(params['bk'], (1, C))
    bv_t = jnp.tile(params['bv'], (1, C))

    # fused QKV weight: every (q|k|v, head) slice starts on a 128-lane boundary,
    # so no sub-vreg lane slicing is needed inside the kernel. Extra zero FLOPs
    # are free (kernel is nowhere near MXU-bound at these shapes).
    w_blocks, b_blocks = [], []
    for wm, bm in ((wq_bd, bq_t), (wk_bd, bk_t), (wv_bd, bv_t)):
        for h in range(H):
            w_blocks.append(pad_cols(wm[:, h * hd:(h + 1) * hd], LB))
            b_blocks.append(pad_cols(bm[:, h * hd:(h + 1) * hd], LB))
    wqkv = jnp.concatenate(w_blocks, axis=1)          # (C*D, 3*H*LB)
    bqkv = jnp.concatenate(b_blocks, axis=1)          # (1, 3*H*LB)

    # out_proj rows padded to match the head lane blocks (zero rows are no-ops)
    wo_big = jnp.concatenate(
        [pad_rows(params['wo'][h * hd:(h + 1) * hd, :], LB) for h in range(H)],
        axis=0)                                       # (H*LB, D)

    if b_block is None:
        # Default: split the batch into two grid steps so the 'parallel' axis
        # spans both v7x TensorCores; the ~0.35 us per-step overhead is noise
        # on v5e/v6e (single TensorCore, steps just run sequentially).
        b_block = B // 2 if (B % 2 == 0 and B >= 2) else B
    bb = b_block
    assert B % bb == 0

    kernel = functools.partial(_co_attn_kernel, num_heads=H, lane_blk=LB,
                               ln_eps=ln_eps)
    const2d = lambda shape: pl.BlockSpec(shape, lambda g: (0, 0))

    return pl.pallas_call(
        kernel,
        out_shape=jax.ShapeDtypeStruct((B, T, D), jnp.float32),
        grid_spec=pltpu.PrefetchScalarGridSpec(
            num_scalar_prefetch=0,
            grid=(B // bb,),
            in_specs=[
                pl.BlockSpec((bb, T, C * D), lambda g: (g, 0, 0)),     # x_flat
                pl.BlockSpec((bb, C, T, D), lambda g: (g, 0, 0, 0)),   # x (residual)
                const2d((C * D, 3 * H * LB)),   # fused, lane-padded qkv weight
                const2d((1, 3 * H * LB)),       # fused qkv bias
                const2d((H * LB, D)),           # out_proj (row-padded per head)
                const2d((1, D)),                # bo
                const2d((1, D)),                # ln gamma
                const2d((1, D)),                # ln beta
            ],
            out_specs=pl.BlockSpec((bb, T, D), lambda g: (g, 0, 0)),
            scratch_shapes=[pltpu.VMEM((bb * T, H * LB), jnp.float32)],
        ),
        compiler_params=pltpu.CompilerParams(dimension_semantics=("parallel",)),
    )(x_flat, x, wqkv, bqkv, wo_big, params['bo'],
      params['gamma'], params['beta'])


def reference(x, params, num_heads, ln_eps=1e-5):
    """Pure-JAX mirror of the PyTorch forward (for verification)."""
    B, C, T, D = x.shape
    E = params['wq'].shape[1]
    Ef = C * E
    H = num_heads
    hd = Ef // H
    scaling = float(hd) ** -0.5

    q = x @ params['wq'] + params['bq'][0]
    k = x @ params['wk'] + params['bk'][0]
    v = x @ params['wv'] + params['bv'][0]
    qf = jnp.transpose(q, (2, 0, 1, 3)).reshape(T, B, Ef) * scaling
    kf = jnp.transpose(k, (2, 0, 1, 3)).reshape(T, B, Ef)
    vf = jnp.transpose(v, (2, 0, 1, 3)).reshape(T, B, Ef)
    qh = qf.reshape(T, B * H, hd).transpose(1, 0, 2)
    kh = kf.reshape(T, B * H, hd).transpose(1, 0, 2)
    vh = vf.reshape(T, B * H, hd).transpose(1, 0, 2)
    scores = jnp.einsum('btd,bsd->bts', qh, kh)
    probs = jax.nn.softmax(scores, axis=-1)
    attn = jnp.einsum('bts,bsd->btd', probs, vh)
    attn = attn.transpose(1, 0, 2).reshape(T, B, Ef)
    attn = attn @ params['wo'] + params['bo'][0]                  # (T, B, D)
    xo = attn.transpose(1, 0, 2)[:, None]                         # (B, 1, T, D)
    z = xo + 2.0 * x
    mu = z.mean(-1, keepdims=True)
    var = ((z - mu) ** 2).mean(-1, keepdims=True)
    zn = (z - mu) / jnp.sqrt(var + ln_eps) * params['gamma'][0] + params['beta'][0]
    return zn.mean(axis=1)


if __name__ == "__main__":
    # Small shapes consistent with the module:
    # C must be 8 because the attention is built with embed_dim*8 == C*embed_dim.
    B, C, T = 2, 8, 16
    out_channels = 32          # == D (feature dim of x)
    embed_dim = 4              # per-channel projection width E
    num_heads = 2
    D, E = out_channels, embed_dim
    Ef = C * E

    key = jax.random.PRNGKey(0)
    ks = jax.random.split(key, 12)
    params = {
        'wq': 0.1 * jax.random.normal(ks[0], (D, E), jnp.float32),
        'bq': 0.1 * jax.random.normal(ks[1], (1, E), jnp.float32),
        'wk': 0.1 * jax.random.normal(ks[2], (D, E), jnp.float32),
        'bk': 0.1 * jax.random.normal(ks[3], (1, E), jnp.float32),
        'wv': 0.1 * jax.random.normal(ks[4], (D, E), jnp.float32),
        'bv': 0.1 * jax.random.normal(ks[5], (1, E), jnp.float32),
        'wo': 0.1 * jax.random.normal(ks[6], (Ef, D), jnp.float32),
        'bo': 0.1 * jax.random.normal(ks[7], (1, D), jnp.float32),
        'gamma': 1.0 + 0.1 * jax.random.normal(ks[8], (1, D), jnp.float32),
        'beta': 0.1 * jax.random.normal(ks[9], (1, D), jnp.float32),
    }
    x = jax.random.normal(ks[10], (B, C, T, D), jnp.float32)

    out = co_attention_simple(x, params, num_heads)
    out = jax.block_until_ready(out)

    ref = reference(x, params, num_heads)
    assert out.shape == (B, T, out_channels)
    assert jnp.allclose(out, ref, rtol=1e-3, atol=1e-3), \
        f"max err {jnp.max(jnp.abs(out - ref))}"
    print("KERNEL_OK")
</pallas_src>

<mosaic_0001>
module attributes {stable_mosaic.version = 11 : i64} {
  func.func @_co_attn_kernel(%arg0: i32, %arg1: memref<1x16x256xf32, #tpu.memory_space<vmem>>, %arg2: memref<1x8x16x32xf32, #tpu.memory_space<vmem>>, %arg3: memref<256x768xf32, #tpu.memory_space<vmem>>, %arg4: memref<1x768xf32, #tpu.memory_space<vmem>>, %arg5: memref<256x32xf32, #tpu.memory_space<vmem>>, %arg6: memref<1x32xf32, #tpu.memory_space<vmem>>, %arg7: memref<1x32xf32, #tpu.memory_space<vmem>>, %arg8: memref<1x32xf32, #tpu.memory_space<vmem>>, %arg9: memref<1x16x32xf32, #tpu.memory_space<vmem>>, %arg10: memref<16x256xf32, #tpu.memory_space<vmem>>) attributes {dimension_semantics = [#tpu.dimension_semantics<parallel>], iteration_bounds = array<i64: 2>, scalar_prefetch = 0 : i64, scratch_operands = 1 : i64, tpu.core_type = #tpu.core_type<tc>, window_params = [{transform_indices = @transform_0, window_bounds = array<i64: 1, 16, 256>}, {transform_indices = @transform_1, window_bounds = array<i64: 1, 8, 16, 32>}, {pipeline_mode = #tpu.pipeline_mode<synchronous>, transform_indices = @transform_2, window_bounds = array<i64: 256, 768>}, {pipeline_mode = #tpu.pipeline_mode<synchronous>, transform_indices = @transform_3, window_bounds = array<i64: 1, 768>}, {pipeline_mode = #tpu.pipeline_mode<synchronous>, transform_indices = @transform_4, window_bounds = array<i64: 256, 32>}, {pipeline_mode = #tpu.pipeline_mode<synchronous>, transform_indices = @transform_5, window_bounds = array<i64: 1, 32>}, {pipeline_mode = #tpu.pipeline_mode<synchronous>, transform_indices = @transform_6, window_bounds = array<i64: 1, 32>}, {pipeline_mode = #tpu.pipeline_mode<synchronous>, transform_indices = @transform_7, window_bounds = array<i64: 1, 32>}, {transform_indices = @transform_8, window_bounds = array<i64: 1, 16, 32>}]} {
    %c0 = arith.constant 0 : index
    %c0_0 = arith.constant 0 : index
    %c0_1 = arith.constant 0 : index
    %0 = vector.load %arg1[%c0, %c0_0, %c0_1] : memref<1x16x256xf32, #tpu.memory_space<vmem>>, vector<1x16x256xf32>
    %1 = vector.shape_cast %0 : vector<1x16x256xf32> to vector<16x256xf32>
    %c0_2 = arith.constant 0 : index
    %c0_3 = arith.constant 0 : index
    %2 = vector.load %arg3[%c0_2, %c0_3] : memref<256x768xf32, #tpu.memory_space<vmem>>, vector<256x768xf32>
    %cst = arith.constant dense<0.000000e+00> : vector<16x768xf32>
    %3 = tpu.matmul %1, %2, %cst {dimension_numbers = #tpu.dot_dimension_numbers<[1], [0], [0], [1], [0, 0, 1, 1], [], []>} : vector<16x256xf32>, vector<256x768xf32>, vector<16x768xf32> -> vector<16x768xf32>
    %c0_4 = arith.constant 0 : index
    %c0_5 = arith.constant 0 : index
    %4 = vector.load %arg4[%c0_4, %c0_5] : memref<1x768xf32, #tpu.memory_space<vmem>>, vector<1x768xf32>
    %5 = vector.broadcast %4 : vector<1x768xf32> to vector<16x768xf32>
    %6 = arith.addf %3, %5 : vector<16x768xf32>
    %c0_6 = arith.constant 0 : index
    %c0_7 = arith.constant 0 : index
    %7 = vector.load %arg5[%c0_6, %c0_7] : memref<256x32xf32, #tpu.memory_space<vmem>>, vector<256x32xf32>
    %c0_8 = arith.constant 0 : index
    %c0_9 = arith.constant 0 : index
    %8 = vector.load %arg6[%c0_8, %c0_9] : memref<1x32xf32, #tpu.memory_space<vmem>>, vector<1x32xf32>
    %c0_10 = arith.constant 0 : index
    %c0_11 = arith.constant 0 : index
    %9 = vector.load %arg7[%c0_10, %c0_11] : memref<1x32xf32, #tpu.memory_space<vmem>>, vector<1x32xf32>
    %c0_12 = arith.constant 0 : index
    %c0_13 = arith.constant 0 : index
    %10 = vector.load %arg8[%c0_12, %c0_13] : memref<1x32xf32, #tpu.memory_space<vmem>>, vector<1x32xf32>
    %11 = vector.extract_strided_slice %6 {offsets = [0, 0], sizes = [16, 128], strides = [1, 1]} : vector<16x768xf32> to vector<16x128xf32>
    %12 = vector.extract_strided_slice %6 {offsets = [0, 256], sizes = [16, 128], strides = [1, 1]} : vector<16x768xf32> to vector<16x128xf32>
    %13 = vector.extract_strided_slice %6 {offsets = [0, 512], sizes = [16, 128], strides = [1, 1]} : vector<16x768xf32> to vector<16x128xf32>
    %cst_14 = arith.constant dense<0.000000e+00> : vector<16x16xf32>
    %14 = tpu.matmul %11, %12, %cst_14 {dimension_numbers = #tpu.dot_dimension_numbers<[1], [1], [0], [0], [0, 0, 1, 0], [], []>} : vector<16x128xf32>, vector<16x128xf32>, vector<16x16xf32> -> vector<16x16xf32>
    %cst_15 = arith.constant dense<0xFF800000> : vector<16xf32>
    %15 = vector.multi_reduction <maximumf>, %14, %cst_15 [1] : vector<16x16xf32> to vector<16xf32>
    %16 = vector.shape_cast %15 : vector<16xf32> to vector<16x1xf32>
    %17 = vector.broadcast %16 : vector<16x1xf32> to vector<16x16xf32>
    %18 = arith.subf %14, %17 : vector<16x16xf32>
    %19 = math.exp %18 : vector<16x16xf32>
    %cst_16 = arith.constant dense<0.000000e+00> : vector<16xf32>
    %20 = vector.multi_reduction <add>, %19, %cst_16 [1] : vector<16x16xf32> to vector<16xf32>
    %21 = vector.shape_cast %20 : vector<16xf32> to vector<16x1xf32>
    %22 = vector.broadcast %21 : vector<16x1xf32> to vector<16x16xf32>
    %23 = arith.divf %19, %22 : vector<16x16xf32>
    %cst_17 = arith.constant dense<0.000000e+00> : vector<16x128xf32>
    %24 = tpu.matmul %23, %13, %cst_17 {dimension_numbers = #tpu.dot_dimension_numbers<[1], [0], [0], [1], [0, 0, 1, 1], [], []>} : vector<16x16xf32>, vector<16x128xf32>, vector<16x128xf32> -> vector<16x128xf32>
    %c0_18 = arith.constant 0 : index
    %c0_19 = arith.constant 0 : index
    %25 = vector.load %arg10[%c0_18, %c0_19] : memref<16x256xf32, #tpu.memory_space<vmem>>, vector<16x128xf32>
    tpu.vector_store %arg10[%c0_18, %c0_19], %24 {strides = array<i32>} : memref<16x256xf32, #tpu.memory_space<vmem>>, vector<16x128xf32>,
    %26 = vector.extract_strided_slice %6 {offsets = [0, 128], sizes = [16, 128], strides = [1, 1]} : vector<16x768xf32> to vector<16x128xf32>
    %27 = vector.extract_strided_slice %6 {offsets = [0, 384], sizes = [16, 128], strides = [1, 1]} : vector<16x768xf32> to vector<16x128xf32>
    %28 = vector.extract_strided_slice %6 {offsets = [0, 640], sizes = [16, 128], strides = [1, 1]} : vector<16x768xf32> to vector<16x128xf32>
    %cst_20 = arith.constant dense<0.000000e+00> : vector<16x16xf32>
    %29 = tpu.matmul %26, %27, %cst_20 {dimension_numbers = #tpu.dot_dimension_numbers<[1], [1], [0], [0], [0, 0, 1, 0], [], []>} : vector<16x128xf32>, vector<16x128xf32>, vector<16x16xf32> -> vector<16x16xf32>
    %cst_21 = arith.constant dense<0xFF800000> : vector<16xf32>
    %30 = vector.multi_reduction <maximumf>, %29, %cst_21 [1] : vector<16x16xf32> to vector<16xf32>
    %31 = vector.shape_cast %30 : vector<16xf32> to vector<16x1xf32>
    %32 = vector.broadcast %31 : vector<16x1xf32> to vector<16x16xf32>
    %33 = arith.subf %29, %32 : vector<16x16xf32>
    %34 = math.exp %33 : vector<16x16xf32>
    %cst_22 = arith.constant dense<0.000000e+00> : vector<16xf32>
    %35 = vector.multi_reduction <add>, %34, %cst_22 [1] : vector<16x16xf32> to vector<16xf32>
    %36 = vector.shape_cast %35 : vector<16xf32> to vector<16x1xf32>
    %37 = vector.broadcast %36 : vector<16x1xf32> to vector<16x16xf32>
    %38 = arith.divf %34, %37 : vector<16x16xf32>
    %cst_23 = arith.constant dense<0.000000e+00> : vector<16x128xf32>
    %39 = tpu.matmul %38, %28, %cst_23 {dimension_numbers = #tpu.dot_dimension_numbers<[1], [0], [0], [1], [0, 0, 1, 1], [], []>} : vector<16x16xf32>, vector<16x128xf32>, vector<16x128xf32> -> vector<16x128xf32>
    %c0_24 = arith.constant 0 : index
    %c128 = arith.constant 128 : index
    %40 = vector.load %arg10[%c0_24, %c128] : memref<16x256xf32, #tpu.memory_space<vmem>>, vector<16x128xf32>
    tpu.vector_store %arg10[%c0_24, %c128], %39 {strides = array<i32>} : memref<16x256xf32, #tpu.memory_space<vmem>>, vector<16x128xf32>,
    %c0_25 = arith.constant 0 : index
    %c0_26 = arith.constant 0 : index
    %41 = vector.load %arg10[%c0_25, %c0_26] : memref<16x256xf32, #tpu.memory_space<vmem>>, vector<16x256xf32>
    %cst_27 = arith.constant dense<0.000000e+00> : vector<16x32xf32>
    %42 = tpu.matmul %41, %7, %cst_27 {dimension_numbers = #tpu.dot_dimension_numbers<[1], [0], [0], [1], [0, 0, 1, 1], [], []>} : vector<16x256xf32>, vector<256x32xf32>, vector<16x32xf32> -> vector<16x32xf32>
    %43 = vector.broadcast %8 : vector<1x32xf32> to vector<16x32xf32>
    %44 = arith.addf %42, %43 : vector<16x32xf32>
    %45 = vector.shape_cast %44 : vector<16x32xf32> to vector<1x1x16x32xf32>
    %c0_28 = arith.constant 0 : index
    %c0_29 = arith.constant 0 : index
    %c0_30 = arith.constant 0 : index
    %c0_31 = arith.constant 0 : index
    %46 = vector.load %arg2[%c0_28, %c0_29, %c0_30, %c0_31] : memref<1x8x16x32xf32, #tpu.memory_space<vmem>>, vector<1x8x16x32xf32>
    %cst_32 = arith.constant 2.000000e+00 : f32
    %47 = vector.broadcast %cst_32 : f32 to vector<1x8x16x32xf32>
    %48 = arith.mulf %47, %46 : vector<1x8x16x32xf32>
    %49 = vector.broadcast %45 : vector<1x1x16x32xf32> to vector<1x8x16x32xf32>
    %50 = arith.addf %49, %48 : vector<1x8x16x32xf32>
    %cst_33 = arith.constant dense<0.000000e+00> : vector<1x8x16xf32>
    %51 = vector.multi_reduction <add>, %50, %cst_33 [3] : vector<1x8x16x32xf32> to vector<1x8x16xf32>
    %52 = vector.shape_cast %51 : vector<1x8x16xf32> to vector<1x8x16x1xf32>
    %cst_34 = arith.constant 3.200000e+01 : f32
    %53 = vector.broadcast %cst_34 : f32 to vector<1x8x16x1xf32>
    %54 = arith.divf %52, %53 : vector<1x8x16x1xf32>
    %55 = vector.broadcast %54 : vector<1x8x16x1xf32> to vector<1x8x16x32xf32>
    %56 = arith.subf %50, %55 : vector<1x8x16x32xf32>
    %57 = arith.mulf %56, %56 : vector<1x8x16x32xf32>
    %cst_35 = arith.constant dense<0.000000e+00> : vector<1x8x16xf32>
    %58 = vector.multi_reduction <add>, %57, %cst_35 [3] : vector<1x8x16x32xf32> to vector<1x8x16xf32>
    %59 = vector.shape_cast %58 : vector<1x8x16xf32> to vector<1x8x16x1xf32>
    %cst_36 = arith.constant 3.200000e+01 : f32
    %60 = vector.broadcast %cst_36 : f32 to vector<1x8x16x1xf32>
    %61 = arith.divf %59, %60 : vector<1x8x16x1xf32>
    %62 = vector.broadcast %54 : vector<1x8x16x1xf32> to vector<1x8x16x32xf32>
    %63 = arith.subf %50, %62 : vector<1x8x16x32xf32>
    %cst_37 = arith.constant 9.99999974E-6 : f32
    %64 = vector.broadcast %cst_37 : f32 to vector<1x8x16x1xf32>
    %65 = arith.addf %61, %64 : vector<1x8x16x1xf32>
    %66 = math.rsqrt %65 : vector<1x8x16x1xf32>
    %67 = vector.broadcast %66 : vector<1x8x16x1xf32> to vector<1x8x16x32xf32>
    %68 = arith.mulf %63, %67 : vector<1x8x16x32xf32>
    %69 = vector.shape_cast %9 : vector<1x32xf32> to vector<1x1x1x32xf32>
    %70 = vector.broadcast %69 : vector<1x1x1x32xf32> to vector<1x8x16x32xf32>
    %71 = arith.mulf %68, %70 : vector<1x8x16x32xf32>
    %72 = vector.shape_cast %10 : vector<1x32xf32> to vector<1x1x1x32xf32>
    %73 = vector.broadcast %72 : vector<1x1x1x32xf32> to vector<1x8x16x32xf32>
    %74 = arith.addf %71, %73 : vector<1x8x16x32xf32>
    %cst_38 = arith.constant dense<0.000000e+00> : vector<1x16x32xf32>
    %75 = vector.multi_reduction <add>, %74, %cst_38 [1] : vector<1x8x16x32xf32> to vector<1x16x32xf32>
    %cst_39 = arith.constant 8.000000e+00 : f32
    %76 = vector.broadcast %cst_39 : f32 to vector<1x16x32xf32>
    %77 = arith.divf %75, %76 : vector<1x16x32xf32>
    %c0_40 = arith.constant 0 : index
    %c0_41 = arith.constant 0 : index
    %c0_42 = arith.constant 0 : index
    %78 = vector.load %arg9[%c0_40, %c0_41, %c0_42] : memref<1x16x32xf32, #tpu.memory_space<vmem>>, vector<1x16x32xf32>
    tpu.vector_store %arg9[%c0_40, %c0_41, %c0_42], %77 {strides = array<i32>} : memref<1x16x32xf32, #tpu.memory_space<vmem>>, vector<1x16x32xf32>,
    return
  }
  func.func @transform_0(%arg0: i32) -> (i32, i32, i32) {
    %c0_i32 = arith.constant 0 : i32
    %c0_i32_0 = arith.constant 0 : i32
    %c0_i32_1 = arith.constant 0 : i32
    return %arg0, %c0_i32, %c0_i32_0 : i32, i32, i32
  }
  func.func @transform_1(%arg0: i32) -> (i32, i32, i32, i32) {
    %c0_i32 = arith.constant 0 : i32
    %c0_i32_0 = arith.constant 0 : i32
    %c0_i32_1 = arith.constant 0 : i32
    %c0_i32_2 = arith.constant 0 : i32
    return %arg0, %c0_i32, %c0_i32_0, %c0_i32_1 : i32, i32, i32, i32
  }
  func.func @transform_2(%arg0: i32) -> (i32, i32) {
    %c0_i32 = arith.constant 0 : i32
    %c0_i32_0 = arith.constant 0 : i32
    %c0_i32_1 = arith.constant 0 : i32
    return %c0_i32, %c0_i32_0 : i32, i32
  }
  func.func @transform_3(%arg0: i32) -> (i32, i32) {
    %c0_i32 = arith.constant 0 : i32
    %c0_i32_0 = arith.constant 0 : i32
    %c0_i32_1 = arith.constant 0 : i32
    return %c0_i32, %c0_i32_0 : i32, i32
  }
  func.func @transform_4(%arg0: i32) -> (i32, i32) {
    %c0_i32 = arith.constant 0 : i32
    %c0_i32_0 = arith.constant 0 : i32
    %c0_i32_1 = arith.constant 0 : i32
    return %c0_i32, %c0_i32_0 : i32, i32
  }
  func.func @transform_5(%arg0: i32) -> (i32, i32) {
    %c0_i32 = arith.constant 0 : i32
    %c0_i32_0 = arith.constant 0 : i32
    %c0_i32_1 = arith.constant 0 : i32
    return %c0_i32, %c0_i32_0 : i32, i32
  }
  func.func @transform_6(%arg0: i32) -> (i32, i32) {
    %c0_i32 = arith.constant 0 : i32
    %c0_i32_0 = arith.constant 0 : i32
    %c0_i32_1 = arith.constant 0 : i32
    return %c0_i32, %c0_i32_0 : i32, i32
  }
  func.func @transform_7(%arg0: i32) -> (i32, i32) {
    %c0_i32 = arith.constant 0 : i32
    %c0_i32_0 = arith.constant 0 : i32
    %c0_i32_1 = arith.constant 0 : i32
    return %c0_i32, %c0_i32_0 : i32, i32
  }
  func.func @transform_8(%arg0: i32) -> (i32, i32, i32) {
    %c0_i32 = arith.constant 0 : i32
    %c0_i32_0 = arith.constant 0 : i32
    %c0_i32_1 = arith.constant 0 : i32
    return %arg0, %c0_i32, %c0_i32_0 : i32, i32, i32
  }
}

</mosaic_0001>

<bundles_post_ra>
// kernel: tpu_custom_call.1
= control target key start
LH: loop header
LB: loop body
LE: loop exit
PB: predicated region body
PF: predicated region fallthrough
CT: control target
= control target key end

     0   :  { %13 = vsyncpa [#allocation4], 0  ;;  %s2870_s0 = inlined_call_operand.vmem [shape: f32[2,16,256], index: 0, kind: input, shape index: {}]   ;;  %s2871_s1 = inlined_call_operand.vmem [shape: f32[2,8,16,32], index: 1, kind: input, shape index: {}]   ;;  %s2872_s2 = inlined_call_operand.hbm [shape: f32[256,768], index: 2, kind: input, shape index: {}]   ;;  %s2873_s3 = inlined_call_operand.vmem [shape: f32[1,768], index: 3, kind: input, shape index: {}]   ;;  %s2874_s4 = inlined_call_operand.vmem [shape: f32[256,32], index: 4, kind: input, shape index: {}]   ;;  %s2875_s5 = inlined_call_operand.vmem [shape: f32[1,32], index: 5, kind: input, shape index: {}]   ;;  %s2876_s6 = inlined_call_operand.vmem [shape: f32[1,32], index: 6, kind: input, shape index: {}]   ;;  %s2877_s7 = inlined_call_operand.vmem [shape: f32[1,32], index: 7, kind: input, shape index: {}]   ;;  %s2878_s8 = inlined_call_operand.hbm [shape: f32[2,16,32], index: 8, kind: output, shape index: {}]  }
   0x1   :  { %14 = vsyncpa [#allocation5], 0 }
   0x2   :  { %16 = vsyncpa [#allocation5 + $0x1], 0  ;;  %s2313_s27 = smov 0   ;;  %s2315_s28 = smov 0  }
   0x3   :  { %s2317_s29 = smov 0   ;;  %s2319_s30 = smov 0  }
   0x4 LB: > { %s2334_s9 = sadd.s32 4294967295, %s2260_s30   ;;  %s1716_s10 = sadd.s32 4294967294, %s2260_s30   ;;  %s2260_s30 = sphi %s2319_s30, %s2894_s30   ;;  %s2256_s29 = sphi %s2317_s29, %s2893_s29   ;;  %s2252_s28 = sphi %s2315_s28, %s2892_s28   ;;  %s2248_s27 = sphi %s2313_s27, %s2891_s27  }
   0x5   : > { %s2338_s11 = sadd.s32 1, %s2260_s30   ;;  %s207_s12 = sadd.s32 1, %s2256_s29 }
   0x6   : > { %s204_s13 = ssub.s32 %s2260_s30, %s2338_s11  ;;  %p217_p0 = scmp.ne.s32.totalorder %s2256_s29, %s2252_s28 }
   0x7   : > { %p205_p1 = scmp.eq.s32.totalorder %s204_s13, 0  ;;  %p218_p2 = scmp.eq.s32.totalorder %s2334_s9, 1 }
   0x8   : > { %p223_p3 = scmp.ne.s32.totalorder %s2252_s28, %s2248_s27  ;;  %p224_p4 = scmp.eq.s32.totalorder %s1716_s10, 1 }
   0x9   : > { %s2349_s14 = scalar_select %p205_p1, %s2256_s29, %s207_s12  }
   0xa   : > { %p2351_p5 = por %p218_p2, %p217_p0  ;;  %p2355_p6 = por %p224_p4, %p223_p3 }
   0xb   : > { %p1717_p7 = scmp.ge.s32.totalorder %s2260_s30, 1  ;;  %p231_p8 = scmp.lt.s32.totalorder %s2260_s30, 3 }
   0xc   : > { %s2882_s15 = scalar_select %p2351_p5, 1, 0 }
   0xd   : > { %s2883_s16 = scalar_select %p2355_p6, 1, 0 }
   0xe   : > { %p2879_p9 = scmp.eq.s32.totalorder %s2334_s9, 0  ;;  %p2362_p10 = pnand %p1717_p7, %p231_p8 }
   0xf   : > { %s2262_s18 = smov [#allocation3]   ;;  %s2166_s23 = scalar_lea.hbm %s2872_s2, 24576 }
  0x10   : > { %s2884_s17 = scalar_select %p2362_p10, 1, 0 }
  0x11   : > { %s243_s19 = sshll.u32 %s2262_s18, 4  ;;  %p2070_p11 = pneg %p2362_p10  ;;  %s244_s19 = int_to_ptr.vmem [resolvable:$true] %s243_s19 }
  0x12   : > { %p2167_p13 = scmp.ne.s32.totalorder %s2872_s2, %s2166_s23  ;;  %p2173_p3 = scmp.lt.u32.totalorder %s2166_s23, %s2872_s2 }
  0x13   : > { %p2370_p12 = pnand %p2879_p9, %p2070_p11 }
  0x15   : > { %p2168_p0 = pneg %p2370_p12 }
  0x17   : > { %p2169_p1 = pnand %p2168_p0, %p2167_p13 }
  0x19   : > { %p2170_p2 = pneg %p2169_p1 }
  0x1b   : > { %p2175_p4 = pnand %p2173_p3, %p2170_p2 }
  0x1d   : > { %2178 = shalt.err (!%p2175_p4)
}
  0x1e   : > { %s2179_s12 = scalar_lea.vmem %s244_s19, 24576  ;;  %p2187_p9 = scmp.lt.s32.totalorder %s244_s19, %s244_s19 }
  0x1f   : > { %p2180_p7 = scmp.ne.s32.totalorder %s244_s19, %s2179_s12  ;;  %p2188_p6 = scmp.lt.s32.totalorder %s2179_s12, %s2179_s12 }
  0x21   : > { %p2182_p8 = pnand %p2180_p7, %p2168_p0  ;;  %p2189_p5 = por %p2188_p6, %p2187_p9 }
  0x23   : > { %p2183_p11 = pneg %p2182_p8 }
  0x25   : > { %p2190_p10 = pnand %p2189_p5, %p2183_p11 }
  0x27   : > { %2193 = shalt.err (!%p2190_p10)
}
  0x28   : > { %s2263_s13 = smov 768   ;;  %s2264_s18 = smov 48  }
  0x29   : > { %2073 = dma.hbm_to_vmem [thread:$0]  (!%p2370_p12), %s2872_s2, 24576, %s244_s19, [#allocation4], %s2263_s13, %s2263_s13, %s2264_s18  }
  0x2a   : > { %p2886_p13 = scmp.ne.s32.totalorder %s2884_s17, 0 }
  0x2b   : > { %p2887_p1 = scmp.eq.s32.totalorder (!%p2886_p13), %s2334_s9, 0 }
  0x2c   : > { %290 = sbr.rel (%p2886_p13) target bundleno = 2214 (0x8a6), region = 52 }
  0x33   : > { %2239 = dma.done.wait (%p2887_p1), [#allocation4], 24576   ;;  %p2888_p0 = pmov %p2887_p1 }
  0x34   : > { %v344_v0 = vld [vmem:[#allocation3 + $0x8] sm:$0xff]  ;;  %v350_v1 = vld [vmem:[#allocation3 + $0x38] sm:$0xff]  ;;  %v343_v5 = vld [vmem:[#allocation3] sm:$0xff]  ;;  %p329_p5 = scmp.lt.s32.totalorder %s2334_s9, 1  ;;  %vm908_vm0 = vcmask 130048   ;;  %vm1327_vm1 = vcmask 261120  }
  0x35   : > { %2241 = vsyncadd (%p2888_p0), [#allocation4], 4294942720  ;;  %v346_v2 = vld [vmem:[#allocation3 + $0x18] sm:$0xff]  ;;  %v1824_v3 = vpack.c.bf16 %v350_v1, %v344_v0  ;;  %v352_v4 = vld [vmem:[#allocation3 + $0x48] sm:$0xff]  ;;  %s326_s12 = sand.u32 1, %s2252_s28   ;;  %s1741_s18 = sshll.u32 %s2334_s9, 8 }
  0x36   : > { %v349_v6 = vld [vmem:[#allocation3 + $0x30] sm:$0xff]  ;;  %v1888_v7 = vpack.c.bf16 %v352_v4, %v346_v2  ;;  %v351_v10 = vld [vmem:[#allocation3 + $0x40] sm:$0xff]  ;;  %v356_v11 = vld [vmem:[#allocation3 + $0x68] sm:$0xff]  ;;  %s2400_s17 = scalar_select %p329_p5, %s2334_s9, 1 }
  0x37   : > { %v1826_v8 = vpack.c.bf16 %v349_v6, %v343_v5  ;;  %v345_v9 = vld [vmem:[#allocation3 + $0x10] sm:$0xff]  ;;  %1825 = vmatprep.subr.bf16.mxu0 %v1824_v3  ;;  %v362_v13 = vld [vmem:[#allocation3 + $0x98] sm:$0xff]  ;;  %v364_v15 = vld [vmem:[#allocation3 + $0xa8] sm:$0xff]  ;;  %s1722_s13 = sshll.u32 %s326_s12, 4  ;;  %s2829_s9 = scalar_lea.sflag [#allocation5], %s326_s12 }
  0x38   : > { %v1890_v12 = vpack.c.bf16 %v351_v10, %v345_v9  ;;  %v358_v14 = vld [vmem:[#allocation3 + $0x78] sm:$0xff]  ;;  %1889 = vmatprep.subr.bf16.mxu1 %v1888_v7  ;;  %v1828_v16 = vpack.c.bf16 %v362_v13, %v356_v11  ;;  %v355_v18 = vld [vmem:[#allocation3 + $0x60] sm:$0xff]  ;;  %v361_v19 = vld [vmem:[#allocation3 + $0x90] sm:$0xff]  ;;  %s1739_s19 = sshll.u32 %s2400_s17, 5  ;;  %s1740_s21 = sshll.u32 %s2400_s17, 7 }
  0x39   : > { %1827 = vmatpush1.bf16.msra.mxu0 %v1826_v8  ;;  %v1892_v17 = vpack.c.bf16 %v364_v15, %v358_v14  ;;  %v357_v20 = vld [vmem:[#allocation3 + $0x70] sm:$0xff]  ;;  %v1830_v21 = vpack.c.bf16 %v361_v19, %v355_v18  ;;  %v363_v22 = vld [vmem:[#allocation3 + $0xa0] sm:$0xff]  ;;  %v368_v23 = vld [vmem:[#allocation3 + $0xc8] sm:$0xff]  ;;  %s2406_s24 = scalar_lea.vmem %s2870_s0, %s1739_s19  ;;  %s2575_s20 = scalar_lea.vmem %s2871_s1, %s1740_s21 }
  0x3a   : > { %1891 = vmatpush1.bf16.msra.mxu1 %v1890_v12  ;;  %v374_v24 = vld [vmem:[#allocation3 + $0xf8] sm:$0xff]  ;;  %1829 = vmatprep.subr.bf16.mxu0 %v1828_v16  ;;  %v1894_v25 = vpack.c.bf16 %v363_v22, %v357_v20  ;;  %v376_v28 = vld [vmem:[#allocation3 + $0x108] sm:$0xff]  ;;  %v367_v29 = vld [vmem:[#allocation3 + $0xc0] sm:$0xff]  ;;  %s328_s21 = scalar_lea.vmem [#allocation6], %s1722_s13  ;;  %s2822_s17 = scalar_lea.hbm %s2878_s8, %s1741_s18 }
  0x3b   : > { %1893 = vmatprep.subr.bf16.mxu1 %v1892_v17  ;;  %v1832_v26 = vpack.c.bf16 %v374_v24, %v368_v23  ;;  %v370_v27 = vld [vmem:[#allocation3 + $0xd8] sm:$0xff]  ;;  %v373_v31 = vld [vmem:[#allocation3 + $0xf0] sm:$0xff]  ;;  %v375_v33 = vld [vmem:[#allocation3 + $0x100] sm:$0xff]  ;;  %s1630_s22 = sshll.u32 %s328_s21, 4  ;;  %p2889_p9 = scmp.ne.s32.totalorder %s2882_s15, 0  ;;  %s2824_s22 = int_to_ptr.vmem [resolvable:$true] %s1630_s22 }
  0x3c   : > { %v1896_v30 = vpack.c.bf16 %v376_v28, %v370_v27  ;;  %v369_v32 = vld [vmem:[#allocation3 + $0xd0] sm:$0xff]  ;;  %v1834_v34 = vpack.c.bf16 %v373_v31, %v367_v29  ;;  %v380_v35 = vld [vmem:[#allocation3 + $0x128] sm:$0xff]  ;;  %v386_v36 = vld [vmem:[#allocation3 + $0x158] sm:$0xff]  ;;  %s2194_s23 = scalar_lea.vmem %s2824_s22, 256 }
  0x3d   : > { %1831 = vmatpush1.bf16.msra.mxu0 %v1830_v21  ;;  %v382_v37 = vld [vmem:[#allocation3 + $0x138] sm:$0xff]  ;;  %v1898_v38 = vpack.c.bf16 %v375_v33, %v369_v32  ;;  %v1836_v39 = vpack.c.bf16 %v386_v36, %v380_v35  ;;  %v388_v40 = vld [vmem:[#allocation3 + $0x168] sm:$0xff]  ;;  %v379_v41 = vld [vmem:[#allocation3 + $0x120] sm:$0xff]  ;;  %p2195_p6 = scmp.ne.s32.totalorder %s2824_s22, %s2194_s23 }
  0x3e   : > { %1895 = vmatpush1.bf16.msra.mxu1 %v1894_v25  ;;  %1833 = vmatprep.subr.bf16.mxu0 %v1832_v26  ;;  %v385_v42 = vld [vmem:[#allocation3 + $0x150] sm:$0xff]  ;;  %v1900_v43 = vpack.c.bf16 %v388_v40, %v382_v37  ;;  %v387_v45 = vld [vmem:[#allocation3 + $0x160] sm:$0xff]  ;;  %v392_v46 = vld [vmem:[#allocation3 + $0x188] sm:$0xff] }
  0x3f   : > { %1897 = vmatprep.subr.bf16.mxu1 %v1896_v30  ;;  %v381_v44 = vld [vmem:[#allocation3 + $0x130] sm:$0xff]  ;;  %v398_v47 = vld [vmem:[#allocation3 + $0x1b8] sm:$0xff]  ;;  %v400_v49 = vld [vmem:[#allocation3 + $0x1c8] sm:$0xff]  ;;  %v1838_v50 = vpack.c.bf16 %v385_v42, %v379_v41  ;;  %p2196_p10 = pnand %p2195_p6, %p2889_p9 }
  0x40   : > { %v394_v48 = vld [vmem:[#allocation3 + $0x198] sm:$0xff]  ;;  %v1902_v51 = vpack.c.bf16 %v387_v45, %v381_v44  ;;  %v1840_v52 = vpack.c.bf16 %v398_v47, %v392_v46  ;;  %v391_v53 = vld [vmem:[#allocation3 + $0x180] sm:$0xff]  ;;  %v397_v54 = vld [vmem:[#allocation3 + $0x1b0] sm:$0xff] }
  0x41   : > { %1835 = vmatpush1.bf16.msra.mxu0 %v1834_v34  ;;  %v393_v55 = vld [vmem:[#allocation3 + $0x190] sm:$0xff]  ;;  %v1904_v56 = vpack.c.bf16 %v400_v49, %v394_v48  ;;  %v399_v57 = vld [vmem:[#allocation3 + $0x1c0] sm:$0xff]  ;;  %v404_v58 = vld [vmem:[#allocation3 + $0x1e8] sm:$0xff]  ;;  %v1842_v62 = vpack.c.bf16 %v397_v54, %v391_v53  ;;  %p2197_p12 = pneg %p2196_p10 }
  0x42   : > { %1899 = vmatpush1.bf16.msra.mxu1 %v1898_v38  ;;  %1837 = vmatprep.subr.bf16.mxu0 %v1836_v39  ;;  %v410_v59 = vld [vmem:[#allocation3 + $0x218] sm:$0xff]  ;;  %v412_v61 = vld [vmem:[#allocation3 + $0x228] sm:$0xff]  ;;  %v1906_v63 = vpack.c.bf16 %v399_v57, %v393_v55  ;;  %v403_v1 = vld [vmem:[#allocation3 + $0x1e0] sm:$0xff] }
  0x43   : > { %1901 = vmatprep.subr.bf16.mxu1 %v1900_v43  ;;  %v406_v60 = vld [vmem:[#allocation3 + $0x1f8] sm:$0xff]  ;;  %v1844_v0 = vpack.c.bf16 %v410_v59, %v404_v58  ;;  %v409_v2 = vld [vmem:[#allocation3 + $0x210] sm:$0xff]  ;;  %v411_v5 = vld [vmem:[#allocation3 + $0x220] sm:$0xff] }
  0x44   : > { %v405_v3 = vld [vmem:[#allocation3 + $0x1f0] sm:$0xff]  ;;  %v1908_v4 = vpack.c.bf16 %v412_v61, %v406_v60  ;;  %v416_v6 = vld [vmem:[#allocation3 + $0x248] sm:$0xff]  ;;  %v422_v7 = vld [vmem:[#allocation3 + $0x278] sm:$0xff]  ;;  %v1846_v10 = vpack.c.bf16 %v409_v2, %v403_v1 }
  0x45   : > { %1839 = vmatpush1.bf16.msra.mxu0 %v1838_v50  ;;  %v418_v8 = vld [vmem:[#allocation3 + $0x258] sm:$0xff]  ;;  %v424_v9 = vld [vmem:[#allocation3 + $0x288] sm:$0xff]  ;;  %v1910_v11 = vpack.c.bf16 %v411_v5, %v405_v3  ;;  %v1848_v12 = vpack.c.bf16 %v422_v7, %v416_v6  ;;  %v415_v13 = vld [vmem:[#allocation3 + $0x240] sm:$0xff] }
  0x46   : > { %1903 = vmatpush1.bf16.msra.mxu1 %v1902_v51  ;;  %1841 = vmatprep.subr.bf16.mxu0 %v1840_v52  ;;  %v421_v14 = vld [vmem:[#allocation3 + $0x270] sm:$0xff]  ;;  %v1912_v16 = vpack.c.bf16 %v424_v9, %v418_v8  ;;  %v423_v17 = vld [vmem:[#allocation3 + $0x280] sm:$0xff]  ;;  %v428_v18 = vld [vmem:[#allocation3 + $0x2a8] sm:$0xff] }
  0x47   : > { %1905 = vmatprep.subr.bf16.mxu1 %v1904_v56  ;;  %v417_v15 = vld [vmem:[#allocation3 + $0x250] sm:$0xff]  ;;  %v434_v19 = vld [vmem:[#allocation3 + $0x2d8] sm:$0xff]  ;;  %v436_v21 = vld [vmem:[#allocation3 + $0x2e8] sm:$0xff]  ;;  %v1850_v22 = vpack.c.bf16 %v421_v14, %v415_v13 }
  0x48   : > { %v430_v20 = vld [vmem:[#allocation3 + $0x2b8] sm:$0xff]  ;;  %v1914_v23 = vpack.c.bf16 %v423_v17, %v417_v15  ;;  %v1852_v24 = vpack.c.bf16 %v434_v19, %v428_v18  ;;  %v427_v25 = vld [vmem:[#allocation3 + $0x2a0] sm:$0xff]  ;;  %v433_v26 = vld [vmem:[#allocation3 + $0x2d0] sm:$0xff] }
  0x49   : > { %1843 = vmatpush1.bf16.msra.mxu0 %v1842_v62  ;;  %v429_v27 = vld [vmem:[#allocation3 + $0x2b0] sm:$0xff]  ;;  %v1916_v28 = vpack.c.bf16 %v436_v21, %v430_v20  ;;  %v435_v29 = vld [vmem:[#allocation3 + $0x2e0] sm:$0xff]  ;;  %v440_v30 = vld [vmem:[#allocation3 + $0x308] sm:$0xff]  ;;  %v1854_v34 = vpack.c.bf16 %v433_v26, %v427_v25 }
  0x4a   : > { %1907 = vmatpush1.bf16.msra.mxu1 %v1906_v63  ;;  %1845 = vmatprep.subr.bf16.mxu0 %v1844_v0  ;;  %v446_v31 = vld [vmem:[#allocation3 + $0x338] sm:$0xff]  ;;  %v448_v33 = vld [vmem:[#allocation3 + $0x348] sm:$0xff]  ;;  %v1918_v35 = vpack.c.bf16 %v435_v29, %v429_v27  ;;  %v439_v37 = vld [vmem:[#allocation3 + $0x300] sm:$0xff] }
  0x4b   : > { %1909 = vmatprep.subr.bf16.mxu1 %v1908_v4  ;;  %v442_v32 = vld [vmem:[#allocation3 + $0x318] sm:$0xff]  ;;  %v1856_v36 = vpack.c.bf16 %v446_v31, %v440_v30  ;;  %v445_v38 = vld [vmem:[#allocation3 + $0x330] sm:$0xff]  ;;  %v447_v41 = vld [vmem:[#allocation3 + $0x340] sm:$0xff] }
  0x4c   : > { %v441_v39 = vld [vmem:[#allocation3 + $0x310] sm:$0xff]  ;;  %v1920_v40 = vpack.c.bf16 %v448_v33, %v442_v32  ;;  %v452_v42 = vld [vmem:[#allocation3 + $0x368] sm:$0xff]  ;;  %v458_v43 = vld [vmem:[#allocation3 + $0x398] sm:$0xff]  ;;  %v1858_v46 = vpack.c.bf16 %v445_v38, %v439_v37 }
  0x4d   : > { %1847 = vmatpush1.bf16.msra.mxu0 %v1846_v10  ;;  %v454_v44 = vld [vmem:[#allocation3 + $0x378] sm:$0xff]  ;;  %v460_v45 = vld [vmem:[#allocation3 + $0x3a8] sm:$0xff]  ;;  %v1922_v47 = vpack.c.bf16 %v447_v41, %v441_v39  ;;  %v1860_v48 = vpack.c.bf16 %v458_v43, %v452_v42  ;;  %v451_v49 = vld [vmem:[#allocation3 + $0x360] sm:$0xff] }
  0x4e   : > { %1911 = vmatpush1.bf16.msra.mxu1 %v1910_v11  ;;  %1849 = vmatprep.subr.bf16.mxu0 %v1848_v12  ;;  %v457_v50 = vld [vmem:[#allocation3 + $0x390] sm:$0xff]  ;;  %v1924_v52 = vpack.c.bf16 %v460_v45, %v454_v44  ;;  %v459_v53 = vld [vmem:[#allocation3 + $0x3a0] sm:$0xff]  ;;  %v464_v54 = vld [vmem:[#allocation3 + $0x3c8] sm:$0xff] }
  0x4f   : > { %1913 = vmatprep.subr.bf16.mxu1 %v1912_v16  ;;  %v453_v51 = vld [vmem:[#allocation3 + $0x370] sm:$0xff]  ;;  %v470_v55 = vld [vmem:[#allocation3 + $0x3f8] sm:$0xff]  ;;  %v472_v57 = vld [vmem:[#allocation3 + $0x408] sm:$0xff]  ;;  %v1862_v58 = vpack.c.bf16 %v457_v50, %v451_v49 }
  0x50   : > { %v466_v56 = vld [vmem:[#allocation3 + $0x3d8] sm:$0xff]  ;;  %v1926_v59 = vpack.c.bf16 %v459_v53, %v453_v51  ;;  %v1864_v60 = vpack.c.bf16 %v470_v55, %v464_v54  ;;  %v463_v61 = vld [vmem:[#allocation3 + $0x3c0] sm:$0xff]  ;;  %v469_v62 = vld [vmem:[#allocation3 + $0x3f0] sm:$0xff] }
  0x51   : > { %1851 = vmatpush1.bf16.msra.mxu0 %v1850_v22  ;;  %v465_v63 = vld [vmem:[#allocation3 + $0x3d0] sm:$0xff]  ;;  %v1928_v0 = vpack.c.bf16 %v472_v57, %v466_v56  ;;  %v471_v1 = vld [vmem:[#allocation3 + $0x400] sm:$0xff]  ;;  %v476_v2 = vld [vmem:[#allocation3 + $0x428] sm:$0xff]  ;;  %v1866_v6 = vpack.c.bf16 %v469_v62, %v463_v61 }
  0x52   : > { %1915 = vmatpush1.bf16.msra.mxu1 %v1914_v23  ;;  %1853 = vmatprep.subr.bf16.mxu0 %v1852_v24  ;;  %v482_v3 = vld [vmem:[#allocation3 + $0x458] sm:$0xff]  ;;  %v484_v5 = vld [vmem:[#allocation3 + $0x468] sm:$0xff]  ;;  %v475_v7 = vld [vmem:[#allocation3 + $0x420] sm:$0xff]  ;;  %v1930_v8 = vpack.c.bf16 %v471_v1, %v465_v63 }
  0x53   : > { %1917 = vmatprep.subr.bf16.mxu1 %v1916_v28  ;;  %v478_v4 = vld [vmem:[#allocation3 + $0x438] sm:$0xff]  ;;  %v1868_v9 = vpack.c.bf16 %v482_v3, %v476_v2  ;;  %v481_v10 = vld [vmem:[#allocation3 + $0x450] sm:$0xff]  ;;  %v483_v12 = vld [vmem:[#allocation3 + $0x460] sm:$0xff] }
  0x54   : > { %v477_v11 = vld [vmem:[#allocation3 + $0x430] sm:$0xff]  ;;  %v1932_v13 = vpack.c.bf16 %v484_v5, %v478_v4  ;;  %v488_v14 = vld [vmem:[#allocation3 + $0x488] sm:$0xff]  ;;  %v494_v15 = vld [vmem:[#allocation3 + $0x4b8] sm:$0xff]  ;;  %v1870_v19 = vpack.c.bf16 %v481_v10, %v475_v7 }
  0x55   : > { %1855 = vmatpush1.bf16.msra.mxu0 %v1854_v34  ;;  %v2409_v16 = vld [vmem:[%s2406_s24 + $0x8] sm:$0xff]  ;;  %v490_v17 = vld [vmem:[#allocation3 + $0x498] sm:$0xff]  ;;  %v1934_v20 = vpack.c.bf16 %v483_v12, %v477_v11  ;;  %v1872_v21 = vpack.c.bf16 %v494_v15, %v488_v14  ;;  %v487_v22 = vld [vmem:[#allocation3 + $0x480] sm:$0xff] }
  0x56   : > { %1919 = vmatpush1.bf16.msra.mxu1 %v1918_v35  ;;  %1857 = vmatprep.subr.bf16.mxu0 %v1856_v36  ;;  %v496_v18 = vld [vmem:[#allocation3 + $0x4c8] sm:$0xff]  ;;  %v493_v23 = vld [vmem:[#allocation3 + $0x4b0] sm:$0xff]  ;;  %v495_v26 = vld [vmem:[#allocation3 + $0x4c0] sm:$0xff] }
  0x57   : > { %1921 = vmatprep.subr.bf16.mxu1 %v1920_v40  ;;  %708 = vmatprep.mubr.f32.mxu1 %v2409_v16  ;;  %v489_v24 = vld [vmem:[#allocation3 + $0x490] sm:$0xff]  ;;  %v1936_v25 = vpack.c.bf16 %v496_v18, %v490_v17  ;;  %v500_v27 = vld [vmem:[#allocation3 + $0x4e8] sm:$0xff]  ;;  %v506_v28 = vld [vmem:[#allocation3 + $0x518] sm:$0xff]  ;;  %v1874_v31 = vpack.c.bf16 %v493_v23, %v487_v22 }
  0x58   : > { %631 = vmatprep.mubr.f32.mxu0 %v2409_v16  ;;  %v502_v29 = vld [vmem:[#allocation3 + $0x4f8] sm:$0xff]  ;;  %v508_v30 = vld [vmem:[#allocation3 + $0x528] sm:$0xff]  ;;  %v1938_v32 = vpack.c.bf16 %v495_v26, %v489_v24  ;;  %v1876_v33 = vpack.c.bf16 %v506_v28, %v500_v27  ;;  %v499_v34 = vld [vmem:[#allocation3 + $0x4e0] sm:$0xff] }
  0x59   : > { %1859 = vmatpush1.bf16.msra.mxu0 %v1858_v46  ;;  %v505_v35 = vld [vmem:[#allocation3 + $0x510] sm:$0xff]  ;;  %v1940_v37 = vpack.c.bf16 %v508_v30, %v502_v29  ;;  %v507_v38 = vld [vmem:[#allocation3 + $0x520] sm:$0xff]  ;;  %v512_v39 = vld [vmem:[#allocation3 + $0x548] sm:$0xff] }
  0x5a   : > { %1923 = vmatpush1.bf16.msra.mxu1 %v1922_v47  ;;  %1861 = vmatprep.subr.bf16.mxu0 %v1860_v48  ;;  %v501_v36 = vld [vmem:[#allocation3 + $0x4f0] sm:$0xff]  ;;  %v518_v40 = vld [vmem:[#allocation3 + $0x578] sm:$0xff]  ;;  %v520_v42 = vld [vmem:[#allocation3 + $0x588] sm:$0xff]  ;;  %v1878_v43 = vpack.c.bf16 %v505_v35, %v499_v34 }
  0x5b   : > { %1925 = vmatprep.subr.bf16.mxu1 %v1924_v52  ;;  %v514_v41 = vld [vmem:[#allocation3 + $0x558] sm:$0xff]  ;;  %v1942_v44 = vpack.c.bf16 %v507_v38, %v501_v36  ;;  %v1880_v45 = vpack.c.bf16 %v518_v40, %v512_v39  ;;  %v511_v46 = vld [vmem:[#allocation3 + $0x540] sm:$0xff]  ;;  %v517_v47 = vld [vmem:[#allocation3 + $0x570] sm:$0xff] }
  0x5c   : > { %v513_v48 = vld [vmem:[#allocation3 + $0x550] sm:$0xff]  ;;  %v1944_v49 = vpack.c.bf16 %v520_v42, %v514_v41  ;;  %v519_v50 = vld [vmem:[#allocation3 + $0x580] sm:$0xff]  ;;  %v524_v51 = vld [vmem:[#allocation3 + $0x5a8] sm:$0xff]  ;;  %v1882_v55 = vpack.c.bf16 %v517_v47, %v511_v46 }
  0x5d   : > { %1863 = vmatpush1.bf16.msra.mxu0 %v1862_v58  ;;  %v530_v52 = vld [vmem:[#allocation3 + $0x5d8] sm:$0xff]  ;;  %v532_v54 = vld [vmem:[#allocation3 + $0x5e8] sm:$0xff]  ;;  %v1946_v56 = vpack.c.bf16 %v519_v50, %v513_v48  ;;  %v523_v58 = vld [vmem:[#allocation3 + $0x5a0] sm:$0xff] }
  0x5e   : > { %1927 = vmatpush1.bf16.msra.mxu1 %v1926_v59  ;;  %1865 = vmatprep.subr.bf16.mxu0 %v1864_v60  ;;  %v526_v53 = vld [vmem:[#allocation3 + $0x5b8] sm:$0xff]  ;;  %v1884_v57 = vpack.c.bf16 %v530_v52, %v524_v51  ;;  %v529_v59 = vld [vmem:[#allocation3 + $0x5d0] sm:$0xff]  ;;  %v531_v62 = vld [vmem:[#allocation3 + $0x5e0] sm:$0xff] }
  0x5f   : > { %1929 = vmatprep.subr.bf16.mxu1 %v1928_v0  ;;  %v525_v60 = vld [vmem:[#allocation3 + $0x5b0] sm:$0xff]  ;;  %v1948_v61 = vpack.c.bf16 %v532_v54, %v526_v53  ;;  %v348_v63 = vld [vmem:[#allocation3 + $0x28] sm:$0xff]  ;;  %v354_v0 = vld [vmem:[#allocation3 + $0x58] sm:$0xff]  ;;  %v1886_v1 = vpack.c.bf16 %v529_v59, %v523_v58 }
  0x60   : > { %v1950_v2 = vpack.c.bf16 %v531_v62, %v525_v60  ;;  %v1952_v3 = vpack.c.bf16 %v354_v0, %v348_v63  ;;  %v347_v4 = vld [vmem:[#allocation3 + $0x20] sm:$0xff]  ;;  %v353_v5 = vld [vmem:[#allocation3 + $0x50] sm:$0xff]  ;;  %v366_v7 = vld [vmem:[#allocation3 + $0xb8] sm:$0xff] }
  0x61   : > { %1867 = vmatpush1.bf16.msra.mxu0 %v1866_v6  ;;  %v360_v6 = vld [vmem:[#allocation3 + $0x88] sm:$0xff]  ;;  %v359_v11 = vld [vmem:[#allocation3 + $0x80] sm:$0xff]  ;;  %v365_v12 = vld [vmem:[#allocation3 + $0xb0] sm:$0xff] }
  0x62   : > { %1931 = vmatpush1.bf16.msra.mxu1 %v1930_v8  ;;  %1869 = vmatprep.subr.bf16.mxu0 %v1868_v9  ;;  %v2414_v8 = vld [vmem:[%s2406_s24] sm:$0xff]  ;;  %v1954_v9 = vpack.c.bf16 %v353_v5, %v347_v4  ;;  %v1956_v10 = vpack.c.bf16 %v366_v7, %v360_v6  ;;  %v372_v14 = vld [vmem:[#allocation3 + $0xe8] sm:$0xff]  ;;  %v378_v15 = vld [vmem:[#allocation3 + $0x118] sm:$0xff]  ;;  %v1958_v17 = vpack.c.bf16 %v365_v12, %v359_v11 }
  0x63   : > { %1933 = vmatprep.subr.bf16.mxu1 %v1932_v13  ;;  %v2417_v13 = vld [vmem:[%s2406_s24 + $0x18] sm:$0xff]  ;;  %v2423_v18 = vld [vmem:[%s2406_s24 + $0x10] sm:$0xff]  ;;  %v384_v22 = vld [vmem:[#allocation3 + $0x148] sm:$0xff]  ;;  %s2265_s24 = smov [#allocation6]  }
  0x64   : > { %v390_v23 = vld [vmem:[#allocation3 + $0x178] sm:$0xff]  ;;  %v383_v26 = vld [vmem:[#allocation3 + $0x140] sm:$0xff]  ;;  %v389_v27 = vld [vmem:[#allocation3 + $0x170] sm:$0xff]  ;;  %s2198_s25 = sshll.u32 %s2265_s24, 4  ;;  %s2199_s25 = int_to_ptr.vmem [resolvable:$false] %s2198_s25 }
  0x65   : > { %1871 = vmatpush1.bf16.msra.mxu0 %v1870_v19  ;;  %v1960_v19 = vpack.c.bf16 %v378_v15, %v372_v14  ;;  %v396_v28 = vld [vmem:[#allocation3 + $0x1a8] sm:$0xff]  ;;  %v402_v29 = vld [vmem:[#allocation3 + $0x1d8] sm:$0xff]  ;;  %v1966_v30 = vpack.c.bf16 %v389_v27, %v383_v26  ;;  %v407_v38 = vld [vmem:[#allocation3 + $0x200] sm:$0xff]  ;;  %s2200_s26 = scalar_lea.vmem %s2199_s25, 512  ;;  %p2201_p2 = scmp.lt.s32.totalorder %s2824_s22, %s2199_s25 }
  0x66   : > { %1935 = vmatpush1.bf16.msra.mxu1 %v1934_v20  ;;  %1873 = vmatprep.subr.bf16.mxu0 %v1872_v21  ;;  %v371_v20 = vld [vmem:[#allocation3 + $0xe0] sm:$0xff]  ;;  %v377_v21 = vld [vmem:[#allocation3 + $0x110] sm:$0xff]  ;;  %v408_v34 = vld [vmem:[#allocation3 + $0x208] sm:$0xff]  ;;  %p2202_p3 = scmp.lt.s32.totalorder %s2200_s26, %s2194_s23 }
  0x67   : > { %1937 = vmatprep.subr.bf16.mxu1 %v1936_v25  ;;  %v1962_v24 = vpack.c.bf16 %v377_v21, %v371_v20  ;;  %v1964_v25 = vpack.c.bf16 %v390_v23, %v384_v22  ;;  %v414_v35 = vld [vmem:[#allocation3 + $0x238] sm:$0xff]  ;;  %v413_v39 = vld [vmem:[#allocation3 + $0x230] sm:$0xff]  ;;  %v420_v40 = vld [vmem:[#allocation3 + $0x268] sm:$0xff] }
  0x68   : > { %v426_v41 = vld [vmem:[#allocation3 + $0x298] sm:$0xff]  ;;  %v437_v50 = vld [vmem:[#allocation3 + $0x2f0] sm:$0xff]  ;;  %v444_v51 = vld [vmem:[#allocation3 + $0x328] sm:$0xff]  ;;  %p2203_p4 = por %p2202_p3, %p2201_p2 }
  0x69   : > { %1875 = vmatpush1.bf16.msra.mxu0 %v1874_v31  ;;  %v1968_v31 = vpack.c.bf16 %v402_v29, %v396_v28  ;;  %v1976_v42 = vpack.c.bf16 %v426_v41, %v420_v40  ;;  %v438_v46 = vld [vmem:[#allocation3 + $0x2f8] sm:$0xff]  ;;  %v461_v62 = vld [vmem:[#allocation3 + $0x3b0] sm:$0xff]  ;;  %v468_v63 = vld [vmem:[#allocation3 + $0x3e8] sm:$0xff]  ;;  %v537_v40 = vlaneseq }
  0x6a   : > { %1939 = vmatpush1.bf16.msra.mxu1 %v1938_v32  ;;  %1877 = vmatprep.subr.bf16.mxu0 %v1876_v33  ;;  %v395_v32 = vld [vmem:[#allocation3 + $0x1a0] sm:$0xff]  ;;  %v401_v33 = vld [vmem:[#allocation3 + $0x1d0] sm:$0xff]  ;;  %v450_v52 = vld [vmem:[#allocation3 + $0x358] sm:$0xff]  ;;  %p2204_p7 = pnand %p2203_p4, %p2197_p12 }
  0x6b   : > { %1941 = vmatprep.subr.bf16.mxu1 %v1940_v37  ;;  %v1970_v36 = vpack.c.bf16 %v401_v33, %v395_v32  ;;  %v1972_v37 = vpack.c.bf16 %v414_v35, %v408_v34  ;;  %v1984_v54 = vpack.c.bf16 %v450_v52, %v444_v51  ;;  %v462_v58 = vld [vmem:[#allocation3 + $0x3b8] sm:$0xff]  ;;  %v473_v4 = vld [vmem:[#allocation3 + $0x410] sm:$0xff]  ;;  %v480_v5 = vld [vmem:[#allocation3 + $0x448] sm:$0xff]  ;;  %v2432_v41 = vshrl.u32 %v537_v40, 7 }
  0x6c   : > { %v474_v0 = vld [vmem:[#allocation3 + $0x418] sm:$0xff]  ;;  %v485_v11 = vld [vmem:[#allocation3 + $0x470] sm:$0xff]  ;;  %v492_v12 = vld [vmem:[#allocation3 + $0x4a8] sm:$0xff] }
  0x6d   : > { %1879 = vmatpush1.bf16.msra.mxu0 %v1878_v43  ;;  %v419_v43 = vld [vmem:[#allocation3 + $0x260] sm:$0xff]  ;;  %v486_v6 = vld [vmem:[#allocation3 + $0x478] sm:$0xff]  ;;  %v497_v20 = vld [vmem:[#allocation3 + $0x4d0] sm:$0xff] }
  0x6e   : > { %1943 = vmatpush1.bf16.msra.mxu1 %v1942_v44  ;;  %1881 = vmatprep.subr.bf16.mxu0 %v1880_v45  ;;  %v425_v44 = vld [vmem:[#allocation3 + $0x290] sm:$0xff]  ;;  %v432_v45 = vld [vmem:[#allocation3 + $0x2c8] sm:$0xff]  ;;  %v498_v14 = vld [vmem:[#allocation3 + $0x4d8] sm:$0xff] }
  0x6f   : > { %1945 = vmatprep.subr.bf16.mxu1 %v1944_v49  ;;  %v1978_v47 = vpack.c.bf16 %v425_v44, %v419_v43  ;;  %v1980_v48 = vpack.c.bf16 %v438_v46, %v432_v45  ;;  %v431_v49 = vld [vmem:[#allocation3 + $0x2c0] sm:$0xff]  ;;  %v504_v21 = vld [vmem:[#allocation3 + $0x508] sm:$0xff]  ;;  %v510_v22 = vld [vmem:[#allocation3 + $0x538] sm:$0xff]  ;;  %v547_v44 = vsub.s32 2, %v2432_v41 }
  0x70   : > { %v1982_v53 = vpack.c.bf16 %v437_v50, %v431_v49  ;;  %v509_v26 = vld [vmem:[#allocation3 + $0x530] sm:$0xff]  ;;  %v516_v27 = vld [vmem:[#allocation3 + $0x568] sm:$0xff]  ;;  %v522_v28 = vld [vmem:[#allocation3 + $0x598] sm:$0xff] }
  0x71   : > { %1883 = vmatpush1.bf16.msra.mxu0 %v1882_v55  ;;  %v443_v55 = vld [vmem:[#allocation3 + $0x320] sm:$0xff]  ;;  %v521_v32 = vld [vmem:[#allocation3 + $0x590] sm:$0xff]  ;;  %v528_v33 = vld [vmem:[#allocation3 + $0x5c8] sm:$0xff] }
  0x72   : > { %1947 = vmatpush1.bf16.msra.mxu1 %v1946_v56  ;;  %1885 = vmatprep.subr.bf16.mxu0 %v1884_v57  ;;  %v449_v56 = vld [vmem:[#allocation3 + $0x350] sm:$0xff]  ;;  %v456_v57 = vld [vmem:[#allocation3 + $0x388] sm:$0xff]  ;;  %v534_v34 = vld [vmem:[#allocation3 + $0x5f8] sm:$0xff] }
  0x73   : > { %1949 = vmatprep.subr.bf16.mxu1 %v1948_v61  ;;  %v1986_v59 = vpack.c.bf16 %v449_v56, %v443_v55  ;;  %v1988_v60 = vpack.c.bf16 %v462_v58, %v456_v57  ;;  %v455_v61 = vld [vmem:[#allocation3 + $0x380] sm:$0xff] }
  0x75   : > { %1887 = vmatpush1.bf16.msra.mxu0 %v1886_v1  ;;  %v1990_v1 = vpack.c.bf16 %v461_v62, %v455_v61  ;;  %v555_v61 = vsub.s32 4, %v2432_v41 }
  0x76   : > { %1951 = vmatpush1.bf16.msra.mxu1 %v1950_v2  ;;  %1953 = vmatprep.subr.bf16.mxu0 %v1952_v3  ;;  %v1992_v2 = vpack.c.bf16 %v474_v0, %v468_v63  ;;  %v467_v3 = vld [vmem:[#allocation3 + $0x3e0] sm:$0xff] }
  0x77   : > { %v1994_v7 = vpack.c.bf16 %v473_v4, %v467_v3 }
  0x78   : > { %632 = vmatmul.mubr.f32.vlgmr.msra.gmra.mrb[0].mxu0 %v2414_v8 }
  0x79   : > { %709 = vmatmul.mubr.f32.vlgmr.msra.gmra.mrb[0].mxu1 %v2414_v8  ;;  %1955 = vmatpush1.bf16.msra.mxu0 %v1954_v9  ;;  %v1996_v9 = vpack.c.bf16 %v486_v6, %v480_v5 }
  0x7a   : > { %714 = vmatprep.mubr.f32.mxu1 %v2417_v13  ;;  %1957 = vmatprep.subr.bf16.mxu0 %v1956_v10  ;;  %v479_v10 = vld [vmem:[#allocation3 + $0x440] sm:$0xff] }
  0x7b   : > { %637 = vmatprep.mubr.f32.mxu0 %v2417_v13  ;;  %v1998_v15 = vpack.c.bf16 %v485_v11, %v479_v10  ;;  %v559_v10 = vsub.s32 5, %v2432_v41 }
  0x7c   : > { %638 = vmatmul.mubr.f32.gmra.mrb[2].mxu0 %v2423_v18 }
  0x7d   : > { %715 = vmatmul.mubr.f32.gmra.mrb[2].mxu1 %v2423_v18  ;;  %1959 = vmatpush1.bf16.msra.mxu0 %v1958_v17  ;;  %v2000_v17 = vpack.c.bf16 %v498_v14, %v492_v12 }
  0x7e   : > { %1961 = vmatprep.subr.bf16.mxu0 %v1960_v19  ;;  %785 = vmatprep.mubr.f32.mxu0 %v2409_v16  ;;  %v1974_v16 = vpack.c.bf16 %v413_v39, %v407_v38  ;;  %v491_v19 = vld [vmem:[#allocation3 + $0x4a0] sm:$0xff]  ;;  %v533_v38 = vld [vmem:[#allocation3 + $0x5f0] sm:$0xff] }
  0x7f   : > { %v2002_v23 = vpack.c.bf16 %v497_v20, %v491_v19 }
  0x81   : > { %1963 = vmatpush1.bf16.msra.mxu0 %v1962_v24  ;;  %v2004_v24 = vpack.c.bf16 %v510_v22, %v504_v21 }
  0x82   : > { %1965 = vmatprep.subr.bf16.mxu0 %v1964_v25  ;;  %v503_v25 = vld [vmem:[#allocation3 + $0x500] sm:$0xff] }
  0x83   : > { %v2006_v29 = vpack.c.bf16 %v509_v26, %v503_v25 }
  0x85   : > { %1967 = vmatpush1.bf16.msra.mxu0 %v1966_v30  ;;  %v2008_v30 = vpack.c.bf16 %v522_v28, %v516_v27 }
  0x86   : > { %1969 = vmatprep.subr.bf16.mxu0 %v1968_v31  ;;  %v515_v31 = vld [vmem:[#allocation3 + $0x560] sm:$0xff] }
  0x87   : > { %v2010_v35 = vpack.c.bf16 %v521_v32, %v515_v31  ;;  %v543_v31 = vsub.s32 1, %v2432_v41 }
  0x89   : > { %1971 = vmatpush1.bf16.msra.mxu0 %v1970_v36  ;;  %v2012_v36 = vpack.c.bf16 %v534_v34, %v528_v33 }
  0x8a   : > { %1973 = vmatprep.subr.bf16.mxu0 %v1972_v37  ;;  %v527_v37 = vld [vmem:[#allocation3 + $0x5c0] sm:$0xff] }
  0x8b   : > { %v2014_v39 = vpack.c.bf16 %v533_v38, %v527_v37 }
  0x8d   : > { %1975 = vmatpush1.bf16.msra.mxu0 %v1974_v16  ;;  %v539_v16 = vsub.s32 0, %v2432_v41 }
  0x8e   : > { %1977 = vmatprep.subr.bf16.mxu0 %v1976_v42  ;;  %v2438_v42 = vld [vmem:[%s2873_s3] sm:$0x3f] }
  0x8f   : > { %v540_v43 = vrot.slane %v2438_v42, %v539_v16  ;;  %v556_v62 = vrot.slane %v2438_v42, %v555_v61  ;;  %v560_v11 = vrot.slane %v2438_v42, %v559_v10  ;;  %v544_v34 = vrot.slane %v2438_v42, %v543_v31  ;;  %v803_v10 = vld [vmem:[%s2874_s4 + $0x28] sm:$0xff]  ;;  %v809_v31 = vld [vmem:[%s2874_s4 + $0x58] sm:$0xff] }
  0x91   : > { %1979 = vmatpush1.bf16.msra.mxu0 %v1978_v47  ;;  %v548_v47 = vrot.slane %v2438_v42, %v547_v44 }
  0x92   : > { %1981 = vmatprep.subr.bf16.mxu0 %v1980_v48 }
  0x95   : > { %1983 = vmatpush1.bf16.msra.mxu0 %v1982_v53 }
  0x96   : > { %1985 = vmatprep.subr.bf16.mxu0 %v1984_v54 }
  0x99   : > { %1987 = vmatpush1.bf16.msra.mxu0 %v1986_v59 }
  0x9a   : > { %1989 = vmatprep.subr.bf16.mxu0 %v1988_v60 }
  0x9d   : > { %1991 = vmatpush1.bf16.msra.mxu0 %v1990_v1 }
  0x9e   : > { %1993 = vmatprep.subr.bf16.mxu0 %v1992_v2 }
  0xa1   : > { %1995 = vmatpush1.bf16.msra.mxu0 %v1994_v7 }
  0xa2   : > { %1997 = vmatprep.subr.bf16.mxu0 %v1996_v9 }
  0xa5   : > { %1999 = vmatpush1.bf16.msra.mxu0 %v1998_v15 }
  0xa6   : > { %2001 = vmatprep.subr.bf16.mxu0 %v2000_v17 }
  0xa9   : > { %2003 = vmatpush1.bf16.msra.mxu0 %v2002_v23 }
  0xaa   : > { %2005 = vmatprep.subr.bf16.mxu0 %v2004_v24 }
  0xad   : > { %2007 = vmatpush1.bf16.msra.mxu0 %v2006_v29 }
  0xae   : > { %2009 = vmatprep.subr.bf16.mxu0 %v2008_v30 }
  0xb1   : > { %2011 = vmatpush1.bf16.msra.mxu0 %v2010_v35 }
  0xb2   : > { %2013 = vmatprep.subr.bf16.mxu0 %v2012_v36 }
  0xb5   : > { %2015 = vmatpush1.bf16.msra.mxu0 %v2014_v39 }
  0xb8   : > { %786 = vmatmul.mubr.f32.vlgmr.msra.gmra.mrb[4].mxu0 %v2414_v8  ;;  %v551_v8 = vsub.s32 3, %v2432_v41 }
  0xb9   : > { %791 = vmatprep.mubr.f32.mxu0 %v2417_v13 }
  0xba   : > { %v552_v49 = vrot.slane %v2438_v42, %v551_v8 }
  0xbc   : > { %792 = vmatmul.mubr.f32.gmra.mrb[6].mxu0 %v2423_v18 }
 0x14b   : > { %v633_v45 = vpop.f32.mrb[0].mxu0 }
 0x14c   : > { %v710_v13 = vpop.f32.mrb[0].mxu1  ;;  %v634_v46 = vadd.f32 %v633_v45, %v540_v43  ;;  %v2443_v18 = vpop.f32.mrb[1].mxu0 }
 0x14d   : > { %v712_v48 = vpop.f32.mrb[1].mxu1  ;;  %v711_v53 = vadd.f32 %v710_v13, %v548_v47  ;;  %v636_v37 = vadd.f32 %v2443_v18, %v544_v34 }
 0x14e   : > { %1800 = vmatprep.mubr.f32.mxu1 %v634_v46  ;;  %v713_v56 = vadd.f32 %v712_v48, %v552_v49 }
 0x14f   : > { %v639_v50 = vpop.f32.mrb[2].mxu0 }
 0x150   : > { %v716_v51 = vpop.f32.mrb[2].mxu1  ;;  %v2447_v52 = vpop.f32.mrb[3].mxu0  ;;  %v640_v60 = vadd.f32 %v639_v50, %v540_v43 }
 0x151   : > { %v717_v54 = vadd.f32 %v716_v51, %v548_v47  ;;  %v718_v55 = vpop.f32.mrb[3].mxu1  ;;  %v642_v38 = vadd.f32 %v2447_v52, %v544_v34  ;;  %v814_v51 = vld [vmem:[%s2874_s4 + $0x80] sm:$0xff]  ;;  %v815_v52 = vld [vmem:[%s2874_s4 + $0x88] sm:$0xff] }
 0x152   : > { %v719_v57 = vadd.f32 %v718_v55, %v552_v49 }
 0x153   : > { %v2016_v58 = vpack.c.bf16 %v717_v54, %v711_v53  ;;  %v2032_v53 = vpack.c.bf16 %v815_v52, %v814_v51  ;;  %v1280_v51 = vld [vmem:[%s2575_s20 + $0x8] sm:$0xff]  ;;  %v1291_v52 = vld [vmem:[%s2575_s20 + $0x60] sm:$0xff] }
 0x154   : > { %v2024_v59 = vpack.c.bf16 %v719_v57, %v713_v56  ;;  %v798_v56 = vld [vmem:[%s2874_s4] sm:$0xff]  ;;  %v799_v57 = vld [vmem:[%s2874_s4 + $0x8] sm:$0xff] }
 0x155   : > { %2017 = vmatprep.subr.bf16.mxu1 %v2016_v58 }
 0x156   : > { %2019 = vmatpush3.bf16.xpose.msra.mxu1 %v2016_v58 }
 0x15d   : > { %1801 = vmatmul.mubr.f32.vlgmr.msra.gmra.mrb[4].mxu1 %v640_v60  ;;  %v817_v60 = vld [vmem:[%s2874_s4 + $0x98] sm:$0xff] }
 0x18b   : > { %v787_v63 = vpop.f32.mrb[4].mxu0 }
 0x18c   : > { %v789_v0 = vpop.f32.mrb[5].mxu0  ;;  %v788_v1 = vadd.f32 %v787_v63, %v556_v62  ;;  %v2034_v63 = vpack.c.bf16 %v799_v57, %v798_v56  ;;  %v1282_v57 = vld [vmem:[%s2575_s20 + $0x18] sm:$0xff] }
 0x18d   : > { %v790_v12 = vadd.f32 %v789_v0, %v560_v11 }
 0x18f   : > { %v793_v2 = vpop.f32.mrb[6].mxu0 }
 0x190   : > { %v794_v3 = vadd.f32 %v793_v2, %v556_v62  ;;  %v795_v14 = vpop.f32.mrb[7].mxu0  ;;  %v800_v2 = vld [vmem:[%s2874_s4 + $0x10] sm:$0xff] }
 0x191   : > { %v796_v15 = vadd.f32 %v795_v14, %v560_v11  ;;  %v820_v11 = vld [vmem:[%s2874_s4 + $0xb0] sm:$0xff] }
 0x192   : > { %v2020_v4 = vpack.c.bf16 %v794_v3, %v788_v1  ;;  %v801_v3 = vld [vmem:[%s2874_s4 + $0x18] sm:$0xff] }
 0x193   : > { %v2028_v17 = vpack.c.bf16 %v796_v15, %v790_v12  ;;  %v821_v12 = vld [vmem:[%s2874_s4 + $0xb8] sm:$0xff] }
 0x194   : > { %2021 = vmatprep.subr.bf16.mxu1 %v2020_v4  ;;  %v2044_v15 = vpack.c.bf16 %v821_v12, %v820_v11 }
 0x195   : > { %2023 = vmatpush3.bf16.msra.mxu1 %v2020_v4  ;;  %v818_v4 = vld [vmem:[%s2874_s4 + $0xa0] sm:$0xff] }
 0x196   : > { %2025 = vmatprep.subr.bf16.mxu1 %v2024_v59 }
 0x230   : > { %v1802_v5 = vpop.f32.mrb[4].mxu1 }
 0x231   : > { %v899_v6 = vpop.f32.mrb[5].mxu1  ;;  %v912_v9 = vsel %vm908_vm0, %v1802_v5, -inf }
 0x232   : > { %v909_v7 = vsel %vm908_vm0, %v899_v6, -inf }
 0x233   : > { %910 = vmax.xlane.f32.xlu0 %v909_v7 }
 0x237   : > { %913 = vmax.xlane.f32.xlu0 %v912_v9  ;;  %v802_v9 = vld [vmem:[%s2874_s4 + $0x20] sm:$0xff] }
 0x238   : > { %v2042_v14 = vpack.c.bf16 %v803_v10, %v802_v9  ;;  %v1296_v9 = vmul.f32 2.0, %v1280_v51  ;;  %v1298_v10 = vmul.f32 2.0, %v1282_v57 }
 0x2c0   : > { %v911_v19 = vpop.xlane.xlu0 %910 }
 0x2c1   : > { %v915_v20 = vsub.f32 %v899_v6, %v911_v19  ;;  %v2038_v6 = vpack.c.bf16 %v801_v3, %v800_v2  ;;  %v805_v19 = vld [vmem:[%s2874_s4 + $0x38] sm:$0xff]  ;;  %v1292_v2 = vld [vmem:[%s2575_s20 + $0x68] sm:$0xff] }
 0x2c3   : > { %v917_v21 = vmul.f32 1.442695, %v915_v20  ;;  %v822_v20 = vld [vmem:[%s2874_s4 + $0xc0] sm:$0xff] }
 0x2c4   : > { %v914_v22 = vpop.xlane.xlu0 %913 }
 0x2c5   : > { %2118 = vpow2.f32 %v917_v21  ;;  %v916_v23 = vsub.f32 %v1802_v5, %v914_v22  ;;  %v819_v5 = vld [vmem:[%s2874_s4 + $0xa8] sm:$0xff] }
 0x2c6   : > { %v2040_v7 = vpack.c.bf16 %v819_v5, %v818_v4  ;;  %v823_v21 = vld [vmem:[%s2874_s4 + $0xc8] sm:$0xff]  ;;  %v1307_v4 = vmul.f32 2.0, %v1291_v52 }
 0x2c7   : > { %v919_v24 = vmul.f32 1.442695, %v916_v23  ;;  %v2048_v23 = vpack.c.bf16 %v823_v21, %v822_v20 }
 0x2c9   : > { %2120 = vpow2.f32 %v919_v24  ;;  %v806_v24 = vld [vmem:[%s2874_s4 + $0x40] sm:$0xff] }
 0x2cf   : > { %v2119_v25 = vpop.eup %2118 }
 0x2d0   : > { %v921_v26 = vsel %vm908_vm0, %v2119_v25, 0.0 }
 0x2d1   : > { %922 = vadd.xlane.f32.xlu1 %v921_v26  ;;  %v824_v26 = vld [vmem:[%s2874_s4 + $0xd0] sm:$0xff] }
 0x2d3   : > { %v2121_v27 = vpop.eup %2120 }
 0x2d4   : > { %v924_v28 = vsel %vm908_vm0, %v2121_v27, 0.0 }
 0x2d5   : > { %925 = vadd.xlane.f32.xlu1 %v924_v28 }
 0x35e   : > { %v923_v29 = vpop.xlane.xlu1 %922 }
 0x35f   : > { %2122 = vrcp.f32 %v923_v29 }
 0x362   : > { %v926_v30 = vpop.xlane.xlu1 %925 }
 0x363   : > { %2124 = vrcp.f32 %v926_v30  ;;  %v808_v30 = vld [vmem:[%s2874_s4 + $0x50] sm:$0xff] }
 0x364   : > { %v2054_v34 = vpack.c.bf16 %v809_v31, %v808_v30 }
 0x369   : > { %v2123_v32 = vpop.eup %2122 }
 0x36a   : > { %v928_v33 = vmul.f32 %v2123_v32, %v2119_v25  ;;  %v807_v25 = vld [vmem:[%s2874_s4 + $0x48] sm:$0xff]  ;;  %v826_v32 = vld [vmem:[%s2874_s4 + $0xe0] sm:$0xff] }
 0x36b   : > { %v2050_v28 = vpack.c.bf16 %v807_v25, %v806_v24  ;;  %v1294_v24 = vld [vmem:[%s2575_s20 + $0x78] sm:$0xff] }
 0x36c   : > { %1807 = vmatprep.mubr.msk.f32.mxu1 %vm908_vm0, %v928_v33  ;;  %v827_v33 = vld [vmem:[%s2874_s4 + $0xe8] sm:$0xff]  ;;  %v1310_v31 = vmul.f32 2.0, %v1294_v24 }
 0x36d   : > { %v2125_v35 = vpop.eup %2124 }
 0x36e   : > { %v930_v36 = vmul.f32 %v2125_v35, %v2121_v27  ;;  %v825_v27 = vld [vmem:[%s2874_s4 + $0xd8] sm:$0xff]  ;;  %v2056_v35 = vpack.c.bf16 %v827_v33, %v826_v32 }
 0x36f   : > { %v2052_v29 = vpack.c.bf16 %v825_v27, %v824_v26 }
 0x370   : > { %1808 = vmatmul.mubr.msk.f32.vlgmr.msra.gmra.mrb[6].mxu1 %vm908_vm0, %v930_v36  ;;  %v810_v36 = vld [vmem:[%s2874_s4 + $0x60] sm:$0xff] }
 0x371   : > { %2027 = vmatpush3.bf16.xpose.msra.mxu1 %v2024_v59  ;;  %1814 = vmatprep.mubr.f32.mxu1 %v636_v37  ;;  %v816_v59 = vld [vmem:[%s2874_s4 + $0x90] sm:$0xff]  ;;  %v811_v37 = vld [vmem:[%s2874_s4 + $0x68] sm:$0xff] }
 0x372   : > { %2029 = vmatprep.subr.bf16.mxu1 %v2028_v17  ;;  %v2036_v1 = vpack.c.bf16 %v817_v60, %v816_v59  ;;  %v1286_v59 = vld [vmem:[%s2575_s20 + $0x38] sm:$0xff] }
 0x378   : > { %1815 = vmatmul.mubr.f32.vlgmr.msra.gmra.mrb[8].mxu1 %v642_v38  ;;  %v828_v38 = vld [vmem:[%s2874_s4 + $0xf0] sm:$0xff] }
 0x379   : > { %2031 = vmatpush3.bf16.msra.mxu1 %v2028_v17  ;;  %v804_v17 = vld [vmem:[%s2874_s4 + $0x30] sm:$0xff] }
 0x37a   : > { %2033 = vmatprep.subr.bf16.mxu1 %v2032_v53  ;;  %v2046_v22 = vpack.c.bf16 %v805_v19, %v804_v17  ;;  %v1293_v53 = vld [vmem:[%s2575_s20 + $0x70] sm:$0xff]  ;;  %v1308_v19 = vmul.f32 2.0, %v1292_v2 }
 0x37b   : > { %v1309_v5 = vmul.f32 2.0, %v1293_v53 }
 0x443   : > { %v2463_v39 = vpop.f32.mrb[6].mxu1 }
 0x444   : > { %v2465_v40 = vpop.f32.mrb[7].mxu1 }
 0x44b   : > { %v1816_v41 = vpop.f32.mrb[8].mxu1 }
 0x44c   : > { %v1080_v16 = vpop.f32.mrb[9].mxu1  ;;  %v1092_v42 = vsel %vm908_vm0, %v1816_v41, -inf }
 0x44d   : > { %1093 = vmax.xlane.f32.xlu1 %v1092_v42  ;;  %v1089_v43 = vsel %vm908_vm0, %v1080_v16, -inf }
 0x44e   : > { %1090 = vmax.xlane.f32.xlu0 %v1089_v43  ;;  %v812_v43 = vld [vmem:[%s2874_s4 + $0x70] sm:$0xff] }
 0x4da   : > { %v1094_v44 = vpop.xlane.xlu1 %1093 }
 0x4db   : > { %v1096_v8 = vsub.f32 %v1816_v41, %v1094_v44  ;;  %v1091_v45 = vpop.xlane.xlu0 %1090  ;;  %v829_v41 = vld [vmem:[%s2874_s4 + $0xf8] sm:$0xff] }
 0x4dc   : > { %v1095_v13 = vsub.f32 %v1080_v16, %v1091_v45  ;;  %v2058_v16 = vpack.c.bf16 %v811_v37, %v810_v36  ;;  %v2060_v42 = vpack.c.bf16 %v829_v41, %v828_v38  ;;  %v813_v44 = vld [vmem:[%s2874_s4 + $0x78] sm:$0xff] }
 0x4dd   : > { %v1099_v46 = vmul.f32 1.442695, %v1096_v8  ;;  %v2062_v8 = vpack.c.bf16 %v813_v44, %v812_v43 }
 0x4de   : > { %v1097_v18 = vmul.f32 1.442695, %v1095_v13 }
 0x4df   : > { %2126 = vpow2.f32 %v1099_v46  ;;  %v1283_v46 = vld [vmem:[%s2575_s20 + $0x20] sm:$0xff] }
 0x4e0   : > { %2128 = vpow2.f32 %v1097_v18  ;;  %v1731_v18 = vld [vmem:[%s2875_s5] ss:$0 sm:$0xff] }
 0x4e9   : > { %v2127_v47 = vpop.eup %2126 }
 0x4ea   : > { %v2129_v48 = vpop.eup %2128  ;;  %v1104_v49 = vsel %vm908_vm0, %v2127_v47, 0.0 }
 0x4eb   : > { %1105 = vadd.xlane.f32.xlu1 %v1104_v49  ;;  %v1101_v50 = vsel %vm908_vm0, %v2129_v48, 0.0  ;;  %v1289_v49 = vld [vmem:[%s2575_s20 + $0x50] sm:$0xff] }
 0x4ec   : > { %1102 = vadd.xlane.f32.xlu0 %v1101_v50  ;;  %v1305_v3 = vmul.f32 2.0, %v1289_v49 }
 0x578   : > { %v1106_v54 = vpop.xlane.xlu1 %1105 }
 0x579   : > { %2130 = vrcp.f32 %v1106_v54  ;;  %v1103_v55 = vpop.xlane.xlu0 %1102 }
 0x57a   : > { %2132 = vrcp.f32 %v1103_v55 }
 0x583   : > { %v2131_v58 = vpop.eup %2130 }
 0x584   : > { %v2133_v61 = vpop.eup %2132  ;;  %v1110_v0 = vmul.f32 %v2131_v58, %v2127_v47  ;;  %v1285_v47 = vld [vmem:[%s2575_s20 + $0x30] sm:$0xff]  ;;  %v1284_v58 = vld [vmem:[%s2575_s20 + $0x28] sm:$0xff] }
 0x585   : > { %v1108_v62 = vmul.f32 %v2133_v61, %v2129_v48  ;;  %v1287_v48 = vld [vmem:[%s2575_s20 + $0x40] sm:$0xff]  ;;  %v1299_v61 = vmul.f32 2.0, %v1283_v46  ;;  %v1300_v11 = vmul.f32 2.0, %v1284_v58 }
 0x587   : > { %1821 = vmatprep.mubr.msk.f32.mxu1 %vm908_vm0, %v1108_v62  ;;  %v1301_v62 = vmul.f32 2.0, %v1285_v47 }
 0x588   : > { %1822 = vmatmul.mubr.msk.f32.vlgmr.msra.gmra.mrb[10].mxu1 %vm908_vm0, %v1110_v0  ;;  %v1288_v0 = vld [vmem:[%s2575_s20 + $0x48] sm:$0xff] }
 0x589   : > { %2035 = vmatpush3.bf16.msra.mxu1 %v2034_v63  ;;  %v1303_v63 = vmul.f32 2.0, %v1287_v48 }
 0x58a   : > { %2037 = vmatprep.subr.bf16.mxu1 %v2036_v1  ;;  %v1290_v1 = vld [vmem:[%s2575_s20 + $0x58] sm:$0xff] }
 0x58b   : > { %v1306_v17 = vmul.f32 2.0, %v1290_v1 }
 0x58d   : > { %2039 = vmatpush3.bf16.msra.mxu1 %v2038_v6 }
 0x58e   : > { %2041 = vmatprep.subr.bf16.mxu1 %v2040_v7 }
 0x591   : > { %2043 = vmatpush3.bf16.msra.mxu1 %v2042_v14  ;;  %v1302_v14 = vmul.f32 2.0, %v1286_v59 }
 0x592   : > { %2045 = vmatprep.subr.bf16.mxu1 %v2044_v15  ;;  %v1304_v15 = vmul.f32 2.0, %v1288_v0 }
 0x595   : > { %2047 = vmatpush3.bf16.msra.mxu1 %v2046_v22 }
 0x596   : > { %2049 = vmatprep.subr.bf16.mxu1 %v2048_v23 }
 0x599   : > { %2051 = vmatpush3.bf16.msra.mxu1 %v2050_v28 }
 0x59a   : > { %2053 = vmatprep.subr.bf16.mxu1 %v2052_v29 }
 0x59d   : > { %2055 = vmatpush3.bf16.msra.mxu1 %v2054_v34 }
 0x59e   : > { %2057 = vmatprep.subr.bf16.mxu1 %v2056_v35 }
 0x5a1   : > { %2059 = vmatpush3.bf16.msra.mxu1 %v2058_v16 }
 0x5a2   : > { %2061 = vmatprep.subr.bf16.mxu1 %v2060_v42 }
 0x5a5   : > { %2063 = vmatpush3.bf16.msra.mxu1 %v2062_v8 }
 0x65b   : > { %v1823_v45 = vpop.f32.mrb[10].mxu1 }
 0x65c   : > { %v1183_v13 = vpop.f32.mrb[11].mxu1 }
 0x65d   : > { %1268 = vmatprep.mubr.f32.mxu1 %v1183_v13 }
 0x65e   : > { %1269 = vmatmul.mubr.f32.vlgmr.msra.gmra.mrb[12].mxu1 %v2465_v40  ;;  %v1279_v40 = vld [vmem:[%s2575_s20] sm:$0xff] }
 0x65f   : > { %1273 = vmatprep.mubr.f32.mxu1 %v1823_v45  ;;  %v1295_v55 = vmul.f32 2.0, %v1279_v40 }
 0x662   : > { %1274 = vmatmul.mubr.f32.gmra.mrb[14].mxu1 %v2463_v39  ;;  %v1281_v39 = vld [vmem:[%s2575_s20 + $0x10] sm:$0xff] }
 0x663   : > { %v1297_v56 = vmul.f32 2.0, %v1281_v39 }
 0x731   : > { %v1790_v50 = vpop.f32.mrb[12].mxu1 }
 0x732   : > { %v1791_v54 = vpop.f32.mrb[13].mxu1 }
 0x733   : > { %v1792_v60 = vadd.f32 %v1791_v54, %v1790_v50 }
 0x735   : > { %v1271_v6 = vadd.f32 %v1792_v60, %v1731_v18  ;;  %v1793_v7 = vpop.f32.mrb[14].mxu1 }
 0x736   : > { %v1794_v12 = vpop.f32.mrb[15].mxu1 }
 0x737   : > { %v1795_v20 = vadd.f32 %v1794_v12, %v1793_v7  ;;  %v1311_v21 = vadd.f32 %v1295_v55, %v1271_v6  ;;  %v1313_v22 = vadd.f32 %v1297_v56, %v1271_v6  ;;  %v2595_v23 = vadd.f32 %v1299_v61, %v1271_v6 }
 0x738   : > { %v2598_v25 = vadd.f32 %v1301_v62, %v1271_v6  ;;  %v2600_v26 = vadd.f32 %v1303_v63, %v1271_v6  ;;  %v2602_v27 = vadd.f32 %v1305_v3, %v1271_v6  ;;  %v2604_v28 = vadd.f32 %v1307_v4, %v1271_v6 }
 0x739   : > { %v1276_v29 = vadd.f32 %v1795_v20, %v1731_v18  ;;  %v1328_v30 = vsel %vm1327_vm1, %v1311_v21, 0.0  ;;  %v2617_v41 = vadd.f32 %v1309_v5, %v1271_v6  ;;  %v1334_v42 = vsel %vm1327_vm1, %v1313_v22, 0.0 }
 0x73a   : > { %1329 = vadd.xlane.f32.xlu0 %v1328_v30  ;;  %v1340_v8 = vsel %vm1327_vm1, %v2595_v23, 0.0  ;;  %v1346_v13 = vsel %vm1327_vm1, %v2598_v25, 0.0  ;;  %v1352_v39 = vsel %vm1327_vm1, %v2600_v26, 0.0  ;;  %v1358_v18 = vsel %vm1327_vm1, %v2602_v27, 0.0 }
 0x73b   : > { %v1312_v32 = vadd.f32 %v1296_v9, %v1276_v29  ;;  %v1314_v33 = vadd.f32 %v1298_v10, %v1276_v29  ;;  %v2607_v34 = vadd.f32 %v1300_v11, %v1276_v29  ;;  %v2609_v35 = vadd.f32 %v1302_v14, %v1276_v29 }
 0x73c   : > { %v2611_v36 = vadd.f32 %v1304_v15, %v1276_v29  ;;  %v2613_v37 = vadd.f32 %v1306_v17, %v1276_v29  ;;  %v2615_v38 = vadd.f32 %v1308_v19, %v1276_v29  ;;  %v2621_v43 = vadd.f32 %v1310_v31, %v1276_v29 }
 0x73d   : > { %v1331_v16 = vsel %vm1327_vm1, %v1312_v32, 0.0  ;;  %v1337_v44 = vsel %vm1327_vm1, %v1314_v33, 0.0  ;;  %v1343_v45 = vsel %vm1327_vm1, %v2607_v34, 0.0  ;;  %v1349_v40 = vsel %vm1327_vm1, %v2609_v35, 0.0 }
 0x73e   : > { %1332 = vadd.xlane.f32.xlu1 %v1331_v16  ;;  %1335 = vadd.xlane.f32.xlu0 %v1334_v42  ;;  %v1355_v46 = vsel %vm1327_vm1, %v2611_v36, 0.0  ;;  %v1361_v47 = vsel %vm1327_vm1, %v2613_v37, 0.0  ;;  %v1364_v48 = vsel %vm1327_vm1, %v2604_v28, 0.0  ;;  %v1367_v49 = vsel %vm1327_vm1, %v2615_v38, 0.0 }
 0x73f   : > { %v1370_v50 = vsel %vm1327_vm1, %v2617_v41, 0.0  ;;  %v1373_v51 = vsel %vm1327_vm1, %v2621_v43, 0.0 }
 0x742   : > { %1338 = vadd.xlane.f32.xlu1 %v1337_v44  ;;  %1341 = vadd.xlane.f32.xlu0 %v1340_v8 }
 0x746   : > { %1344 = vadd.xlane.f32.xlu1 %v1343_v45  ;;  %1347 = vadd.xlane.f32.xlu0 %v1346_v13 }
 0x74a   : > { %1350 = vadd.xlane.f32.xlu1 %v1349_v40  ;;  %1353 = vadd.xlane.f32.xlu0 %v1352_v39 }
 0x74e   : > { %1356 = vadd.xlane.f32.xlu1 %v1355_v46  ;;  %1359 = vadd.xlane.f32.xlu0 %v1358_v18 }
 0x752   : > { %1362 = vadd.xlane.f32.xlu1 %v1361_v47  ;;  %1365 = vadd.xlane.f32.xlu0 %v1364_v48 }
 0x756   : > { %1368 = vadd.xlane.f32.xlu1 %v1367_v49  ;;  %1371 = vadd.xlane.f32.xlu0 %v1370_v50 }
 0x75a   : > { %1374 = vadd.xlane.f32.xlu1 %v1373_v51 }
 0x7c7   : > { %v1330_v52 = vpop.xlane.xlu0 %1329 }
 0x7c8   : > { %v1377_v53 = vmul.f32 0.03125, %v1330_v52 }
 0x7ca   : > { %v2648_v54 = vsub.f32 %v1311_v21, %v1377_v53 }
 0x7cb   : > { %v1333_v55 = vpop.xlane.xlu1 %1332  ;;  %v1336_v56 = vpop.xlane.xlu0 %1335 }
 0x7cc   : > { %v1378_v57 = vmul.f32 0.03125, %v1333_v55  ;;  %v1379_v58 = vmul.f32 0.03125, %v1336_v56  ;;  %v1409_v59 = vmul.f32 %v2648_v54, %v2648_v54 }
 0x7ce   : > { %v2652_v60 = vsub.f32 %v1312_v32, %v1378_v57  ;;  %v2654_v61 = vsub.f32 %v1313_v22, %v1379_v58  ;;  %v1425_v62 = vsel %vm1327_vm1, %v1409_v59, 0.0 }
 0x7cf   : > { %v1339_v63 = vpop.xlane.xlu1 %1338  ;;  %1426 = vadd.xlane.f32.xlu0 %v1425_v62  ;;  %v1342_v0 = vpop.xlane.xlu0 %1341 }
 0x7d0   : > { %v1380_v1 = vmul.f32 0.03125, %v1339_v63  ;;  %v1381_v2 = vmul.f32 0.03125, %v1342_v0  ;;  %v1410_v3 = vmul.f32 %v2652_v60, %v2652_v60  ;;  %v1411_v4 = vmul.f32 %v2654_v61, %v2654_v61 }
 0x7d2   : > { %v2661_v5 = vsub.f32 %v1314_v33, %v1380_v1  ;;  %v2664_v6 = vsub.f32 %v2595_v23, %v1381_v2  ;;  %v1428_v7 = vsel %vm1327_vm1, %v1410_v3, 0.0  ;;  %v1431_v9 = vsel %vm1327_vm1, %v1411_v4, 0.0 }
 0x7d3   : > { %1429 = vadd.xlane.f32.xlu1 %v1428_v7  ;;  %v1345_v10 = vpop.xlane.xlu1 %1344  ;;  %1432 = vadd.xlane.f32.xlu0 %v1431_v9  ;;  %v1348_v11 = vpop.xlane.xlu0 %1347 }
 0x7d4   : > { %v1382_v12 = vmul.f32 0.03125, %v1345_v10  ;;  %v1383_v14 = vmul.f32 0.03125, %v1348_v11  ;;  %v1412_v15 = vmul.f32 %v2661_v5, %v2661_v5  ;;  %v1413_v17 = vmul.f32 %v2664_v6, %v2664_v6 }
 0x7d6   : > { %v2673_v19 = vsub.f32 %v2607_v34, %v1382_v12  ;;  %v2676_v20 = vsub.f32 %v2598_v25, %v1383_v14  ;;  %v1434_v21 = vsel %vm1327_vm1, %v1412_v15, 0.0  ;;  %v1437_v22 = vsel %vm1327_vm1, %v1413_v17, 0.0 }
 0x7d7   : > { %1435 = vadd.xlane.f32.xlu1 %v1434_v21  ;;  %v1351_v23 = vpop.xlane.xlu1 %1350  ;;  %1438 = vadd.xlane.f32.xlu0 %v1437_v22  ;;  %v1354_v24 = vpop.xlane.xlu0 %1353 }
 0x7d8   : > { %v1384_v29 = vmul.f32 0.03125, %v1351_v23  ;;  %v1385_v30 = vmul.f32 0.03125, %v1354_v24  ;;  %v1414_v31 = vmul.f32 %v2673_v19, %v2673_v19  ;;  %v1415_v32 = vmul.f32 %v2676_v20, %v2676_v20 }
 0x7da   : > { %v2685_v33 = vsub.f32 %v2609_v35, %v1384_v29  ;;  %v2688_v25 = vsub.f32 %v2600_v26, %v1385_v30  ;;  %v1440_v34 = vsel %vm1327_vm1, %v1414_v31, 0.0  ;;  %v1443_v16 = vsel %vm1327_vm1, %v1415_v32, 0.0 }
 0x7db   : > { %1441 = vadd.xlane.f32.xlu1 %v1440_v34  ;;  %v1357_v42 = vpop.xlane.xlu1 %1356  ;;  %1444 = vadd.xlane.f32.xlu0 %v1443_v16  ;;  %v1360_v44 = vpop.xlane.xlu0 %1359 }
 0x7dc   : > { %v1386_v8 = vmul.f32 0.03125, %v1357_v42  ;;  %v1387_v45 = vmul.f32 0.03125, %v1360_v44  ;;  %v1416_v13 = vmul.f32 %v2685_v33, %v2685_v33  ;;  %v1417_v35 = vmul.f32 %v2688_v25, %v2688_v25 }
 0x7de   : > { %v2697_v40 = vsub.f32 %v2611_v36, %v1386_v8  ;;  %v2700_v26 = vsub.f32 %v2602_v27, %v1387_v45  ;;  %v1446_v39 = vsel %vm1327_vm1, %v1416_v13, 0.0  ;;  %v1449_v46 = vsel %vm1327_vm1, %v1417_v35, 0.0 }
 0x7df   : > { %1447 = vadd.xlane.f32.xlu1 %v1446_v39  ;;  %v1363_v18 = vpop.xlane.xlu1 %1362  ;;  %1450 = vadd.xlane.f32.xlu0 %v1449_v46  ;;  %v1366_v47 = vpop.xlane.xlu0 %1365 }
 0x7e0   : > { %v1388_v48 = vmul.f32 0.03125, %v1363_v18  ;;  %v1389_v49 = vmul.f32 0.03125, %v1366_v47  ;;  %v1418_v50 = vmul.f32 %v2697_v40, %v2697_v40  ;;  %v1419_v36 = vmul.f32 %v2700_v26, %v2700_v26 }
 0x7e2   : > { %v2709_v51 = vsub.f32 %v2613_v37, %v1388_v48  ;;  %v2712_v27 = vsub.f32 %v2604_v28, %v1389_v49  ;;  %v1452_v52 = vsel %vm1327_vm1, %v1418_v50, 0.0  ;;  %v1455_v53 = vsel %vm1327_vm1, %v1419_v36, 0.0 }
 0x7e3   : > { %1453 = vadd.xlane.f32.xlu1 %v1452_v52  ;;  %v1369_v55 = vpop.xlane.xlu1 %1368  ;;  %1456 = vadd.xlane.f32.xlu0 %v1455_v53  ;;  %v1372_v56 = vpop.xlane.xlu0 %1371 }
 0x7e4   : > { %v1390_v57 = vmul.f32 0.03125, %v1369_v55  ;;  %v1391_v58 = vmul.f32 0.03125, %v1372_v56  ;;  %v1420_v59 = vmul.f32 %v2709_v51, %v2709_v51  ;;  %v1421_v37 = vmul.f32 %v2712_v27, %v2712_v27 }
 0x7e6   : > { %v2721_v62 = vsub.f32 %v2615_v38, %v1390_v57  ;;  %v2724_v28 = vsub.f32 %v2617_v41, %v1391_v58  ;;  %v1458_v63 = vsel %vm1327_vm1, %v1420_v59, 0.0  ;;  %v1461_v0 = vsel %vm1327_vm1, %v1421_v37, 0.0 }
 0x7e7   : > { %1459 = vadd.xlane.f32.xlu1 %v1458_v63  ;;  %v1375_v1 = vpop.xlane.xlu1 %1374  ;;  %1462 = vadd.xlane.f32.xlu0 %v1461_v0 }
 0x7e8   : > { %v1392_v2 = vmul.f32 0.03125, %v1375_v1  ;;  %v1422_v3 = vmul.f32 %v2721_v62, %v2721_v62  ;;  %v1423_v4 = vmul.f32 %v2724_v28, %v2724_v28 }
 0x7ea   : > { %v2733_v38 = vsub.f32 %v2621_v43, %v1392_v2  ;;  %v1464_v41 = vsel %vm1327_vm1, %v1422_v3, 0.0  ;;  %v1467_v7 = vsel %vm1327_vm1, %v1423_v4, 0.0 }
 0x7eb   : > { %1465 = vadd.xlane.f32.xlu1 %v1464_v41  ;;  %1468 = vadd.xlane.f32.xlu0 %v1467_v7  ;;  %v2744_v41 = vld [vmem:[%s2876_s6] ss:$0 sm:$0xff] }
 0x7ec   : > { %v1424_v9 = vmul.f32 %v2733_v38, %v2733_v38 }
 0x7ee   : > { %v1470_v10 = vsel %vm1327_vm1, %v1424_v9, 0.0 }
 0x7ef   : > { %1471 = vadd.xlane.f32.xlu1 %v1470_v10 }
 0x85c   : > { %v1427_v11 = vpop.xlane.xlu0 %1426 }
 0x85d   : > { %v1473_v12 = vmul.f32 0.03125, %v1427_v11 }
 0x85f   : > { %v1489_v22 = vadd.f32 1e-05, %v1473_v12 }
 0x860   : > { %v1430_v14 = vpop.xlane.xlu1 %1429  ;;  %v1433_v15 = vpop.xlane.xlu0 %1432 }
 0x861   : > { %v1474_v17 = vmul.f32 0.03125, %v1430_v14  ;;  %v1475_v21 = vmul.f32 0.03125, %v1433_v15 }
 0x863   : > { %v1491_v43 = vadd.f32 1e-05, %v1475_v21  ;;  %v1490_v29 = vadd.f32 1e-05, %v1474_v17 }
 0x864   : > { %v1436_v23 = vpop.xlane.xlu1 %1435  ;;  %v1439_v24 = vpop.xlane.xlu0 %1438 }
 0x865   : > { %v1476_v30 = vmul.f32 0.03125, %v1436_v23  ;;  %v1477_v31 = vmul.f32 0.03125, %v1439_v24  ;;  %2134 = vrsqrt.f32 %v1491_v43 }
 0x866   : > { %2136 = vrsqrt.f32 %v1489_v22 }
 0x867   : > { %v1492_v32 = vadd.f32 1e-05, %v1476_v30  ;;  %v1493_v34 = vadd.f32 1e-05, %v1477_v31  ;;  %2138 = vrsqrt.f32 %v1490_v29 }
 0x868   : > { %v1442_v16 = vpop.xlane.xlu1 %1441  ;;  %v1445_v42 = vpop.xlane.xlu0 %1444 }
 0x869   : > { %v1478_v44 = vmul.f32 0.03125, %v1442_v16  ;;  %v1479_v8 = vmul.f32 0.03125, %v1445_v42  ;;  %2140 = vrsqrt.f32 %v1493_v34 }
 0x86a   : > { %2142 = vrsqrt.f32 %v1492_v32 }
 0x86b   : > { %v1494_v45 = vadd.f32 1e-05, %v1478_v44  ;;  %v1495_v13 = vadd.f32 1e-05, %v1479_v8 }
 0x86c   : > { %v1448_v35 = vpop.xlane.xlu1 %1447  ;;  %v1451_v39 = vpop.xlane.xlu0 %1450 }
 0x86d   : > { %2144 = vrsqrt.f32 %v1494_v45  ;;  %v1480_v46 = vmul.f32 0.03125, %v1448_v35  ;;  %v1481_v18 = vmul.f32 0.03125, %v1451_v39 }
 0x86e   : > { %2146 = vrsqrt.f32 %v1495_v13 }
 0x86f   : > { %v1496_v47 = vadd.f32 1e-05, %v1480_v46  ;;  %v1497_v48 = vadd.f32 1e-05, %v1481_v18  ;;  %v2135_v36 = vpop.eup %2134 }
 0x870   : > { %v1454_v49 = vpop.xlane.xlu1 %1453  ;;  %v1457_v50 = vpop.xlane.xlu0 %1456  ;;  %v1523_v37 = vmul.f32 %v2135_v36, %v2654_v61 }
 0x871   : > { %2148 = vrsqrt.f32 %v1496_v47  ;;  %v1482_v52 = vmul.f32 0.03125, %v1454_v49  ;;  %v1483_v53 = vmul.f32 0.03125, %v1457_v50  ;;  %v2137_v55 = vpop.eup %2136 }
 0x872   : > { %2150 = vrsqrt.f32 %v1497_v48  ;;  %v2139_v56 = vpop.eup %2138  ;;  %v1521_v7 = vmul.f32 %v2137_v55, %v2648_v54  ;;  %v1545_v12 = vmul.f32 %v2744_v41, %v1523_v37 }
 0x873   : > { %v1498_v57 = vadd.f32 1e-05, %v1482_v52  ;;  %v1499_v58 = vadd.f32 1e-05, %v1483_v53  ;;  %v2141_v59 = vpop.eup %2140  ;;  %v1522_v9 = vmul.f32 %v2139_v56, %v2652_v60 }
 0x874   : > { %v1460_v63 = vpop.xlane.xlu1 %1459  ;;  %v1463_v0 = vpop.xlane.xlu0 %1462  ;;  %v1525_v10 = vmul.f32 %v2141_v59, %v2664_v6  ;;  %v2756_v6 = vld [vmem:[%s2877_s7] ss:$0 sm:$0xff]  ;;  %v1543_v24 = vmul.f32 %v2744_v41, %v1521_v7 }
 0x875   : > { %v2143_v1 = vpop.eup %2142  ;;  %2152 = vrsqrt.f32 %v1498_v57  ;;  %v1484_v2 = vmul.f32 0.03125, %v1460_v63  ;;  %v1485_v3 = vmul.f32 0.03125, %v1463_v0  ;;  %v1567_v31 = vadd.f32 %v2756_v6, %v1545_v12 }
 0x876   : > { %2154 = vrsqrt.f32 %v1499_v58  ;;  %v1524_v14 = vmul.f32 %v2143_v1, %v2661_v5  ;;  %v1544_v5 = vmul.f32 %v2744_v41, %v1522_v9  ;;  %v1547_v29 = vmul.f32 %v2744_v41, %v1525_v10 }
 0x877   : > { %v2145_v4 = vpop.eup %2144  ;;  %v1500_v61 = vadd.f32 1e-05, %v1484_v2  ;;  %v1501_v15 = vadd.f32 1e-05, %v1485_v3  ;;  %v1565_v35 = vadd.f32 %v2756_v6, %v1543_v24  ;;  %v1582_v50 = vsel %vm1327_vm1, %v1567_v31, 0.0 }
 0x878   : > { %v2147_v11 = vpop.eup %2146  ;;  %v1466_v17 = vpop.xlane.xlu1 %1465  ;;  %v1526_v23 = vmul.f32 %v2145_v4, %v2673_v19  ;;  %v1546_v19 = vmul.f32 %v2744_v41, %v1524_v14  ;;  %v1569_v39 = vadd.f32 %v2756_v6, %v1547_v29  ;;  %v1566_v47 = vadd.f32 %v2756_v6, %v1544_v5 }
 0x879   : > { %v1469_v21 = vpop.xlane.xlu0 %1468  ;;  %v1527_v43 = vmul.f32 %v2147_v11, %v2676_v20  ;;  %2156 = vrsqrt.f32 %v1500_v61  ;;  %v1486_v22 = vmul.f32 0.03125, %v1466_v17  ;;  %v1581_v57 = vsel %vm1327_vm1, %v1565_v35, 0.0 }
 0x87a   : > { %2158 = vrsqrt.f32 %v1501_v15  ;;  %v1487_v54 = vmul.f32 0.03125, %v1469_v21  ;;  %v1548_v45 = vmul.f32 %v2744_v41, %v1526_v23  ;;  %v1568_v48 = vadd.f32 %v2756_v6, %v1546_v19 }
 0x87b   : > { %v2149_v60 = vpop.eup %2148  ;;  %v1502_v30 = vadd.f32 1e-05, %v1486_v22  ;;  %v1549_v42 = vmul.f32 %v2744_v41, %v1527_v43  ;;  %v1584_v58 = vsel %vm1327_vm1, %v1569_v39, 0.0  ;;  %v1583_v63 = vadd.f32 %v1582_v50, %v1581_v57 }
 0x87c   : > { %v2151_v20 = vpop.eup %2150  ;;  %v1528_v32 = vmul.f32 %v2149_v60, %v2685_v33  ;;  %v1503_v34 = vadd.f32 1e-05, %v1487_v54  ;;  %v1472_v16 = vpop.xlane.xlu1 %1471  ;;  %v1570_v53 = vadd.f32 %v2756_v6, %v1548_v45  ;;  %v1597_v0 = vsel %vm1327_vm1, %v1568_v48, 0.0 }
 0x87d   : > { %v1529_v44 = vmul.f32 %v2151_v20, %v2688_v25  ;;  %2160 = vrsqrt.f32 %v1502_v30  ;;  %v1488_v8 = vmul.f32 0.03125, %v1472_v16  ;;  %v1571_v36 = vadd.f32 %v2756_v6, %v1549_v42 }
 0x87e   : > { %2162 = vrsqrt.f32 %v1503_v34  ;;  %v1550_v25 = vmul.f32 %v2744_v41, %v1528_v32  ;;  %v1596_v2 = vsel %vm1327_vm1, %v1566_v47, 0.0  ;;  %v1585_v9 = vadd.f32 %v1584_v58, %v1583_v63 }
 0x87f   : > { %v2153_v13 = vpop.eup %2152  ;;  %v1551_v46 = vmul.f32 %v2744_v41, %v1529_v44  ;;  %v1504_v18 = vadd.f32 1e-05, %v1488_v8  ;;  %v1586_v3 = vsel %vm1327_vm1, %v1571_v36, 0.0  ;;  %v1599_v10 = vsel %vm1327_vm1, %v1570_v53, 0.0 }
 0x880   : > { %v2155_v33 = vpop.eup %2154  ;;  %v1530_v49 = vmul.f32 %v2153_v13, %v2697_v40  ;;  %v1598_v14 = vadd.f32 %v1597_v0, %v1596_v2  ;;  %v1587_v21 = vadd.f32 %v1586_v3, %v1585_v9 }
 0x881   : > { %v1531_v52 = vmul.f32 %v2155_v33, %v2700_v26  ;;  %2164 = vrsqrt.f32 %v1504_v18  ;;  %v1573_v59 = vadd.f32 %v2756_v6, %v1551_v46  ;;  %v1572_v26 = vadd.f32 %v2756_v6, %v1550_v25 }
 0x882   : > { %v1552_v55 = vmul.f32 %v2744_v41, %v1530_v49  ;;  %v1600_v23 = vadd.f32 %v1599_v10, %v1598_v14 }
 0x883   : > { %v2157_v56 = vpop.eup %2156  ;;  %v1553_v40 = vmul.f32 %v2744_v41, %v1531_v52  ;;  %v1601_v43 = vsel %vm1327_vm1, %v1572_v26, 0.0 }
 0x884   : > { %v2159_v37 = vpop.eup %2158  ;;  %v1532_v1 = vmul.f32 %v2157_v56, %v2709_v51  ;;  %v1574_v61 = vadd.f32 %v2756_v6, %v1552_v55  ;;  %v1588_v51 = vsel %vm1327_vm1, %v1573_v59, 0.0  ;;  %v1602_v31 = vadd.f32 %v1601_v43, %v1600_v23 }
 0x885   : > { %v1575_v4 = vadd.f32 %v2756_v6, %v1553_v40  ;;  %v1533_v7 = vmul.f32 %v2159_v37, %v2712_v27  ;;  %v1589_v5 = vadd.f32 %v1588_v51, %v1587_v21 }
 0x886   : > { %v1554_v11 = vmul.f32 %v2744_v41, %v1532_v1  ;;  %v1603_v29 = vsel %vm1327_vm1, %v1574_v61, 0.0 }
 0x887   : > { %v2161_v12 = vpop.eup %2160  ;;  %v1555_v15 = vmul.f32 %v2744_v41, %v1533_v7  ;;  %v1590_v54 = vsel %vm1327_vm1, %v1575_v4, 0.0  ;;  %v1604_v42 = vadd.f32 %v1603_v29, %v1602_v31 }
 0x888   : > { %v2163_v17 = vpop.eup %2162  ;;  %v1576_v27 = vadd.f32 %v2756_v6, %v1554_v11  ;;  %v1534_v22 = vmul.f32 %v2161_v12, %v2721_v62  ;;  %v1591_v32 = vadd.f32 %v1590_v54, %v1589_v5 }
 0x889   : > { %v1577_v60 = vadd.f32 %v2756_v6, %v1555_v15  ;;  %v1535_v24 = vmul.f32 %v2163_v17, %v2724_v28 }
 0x88a   : > { %v1556_v30 = vmul.f32 %v2744_v41, %v1534_v22  ;;  %v1605_v34 = vsel %vm1327_vm1, %v1576_v27, 0.0 }
 0x88b   : > { %v2165_v20 = vpop.eup %2164  ;;  %v1592_v19 = vsel %vm1327_vm1, %v1577_v60, 0.0  ;;  %v1557_v62 = vmul.f32 %v2744_v41, %v1535_v24  ;;  %v1606_v35 = vadd.f32 %v1605_v34, %v1604_v42 }
 0x88c   : > { %v1578_v16 = vadd.f32 %v2756_v6, %v1556_v30  ;;  %v1536_v28 = vmul.f32 %v2165_v20, %v2733_v38  ;;  %v1593_v8 = vadd.f32 %v1592_v19, %v1591_v32 }
 0x88d   : > { %v1579_v44 = vadd.f32 %v2756_v6, %v1557_v62 }
 0x88e   : > { %v1607_v45 = vsel %vm1327_vm1, %v1578_v16, 0.0  ;;  %v1558_v13 = vmul.f32 %v2744_v41, %v1536_v28 }
 0x88f   : > { %v1594_v39 = vsel %vm1327_vm1, %v1579_v44, 0.0  ;;  %v1608_v33 = vadd.f32 %v1607_v45, %v1606_v35 }
 0x890   : > { %v1595_v46 = vadd.f32 %v1594_v39, %v1593_v8  ;;  %v1580_v18 = vadd.f32 %v2756_v6, %v1558_v13 }
 0x892   : > { %v1612_v38 = vmul.f32 0.125, %v1595_v46  ;;  %v1609_v47 = vsel %vm1327_vm1, %v1580_v18, 0.0 }
 0x893   : > { %v1610_v48 = vadd.f32 %v1609_v47, %v1608_v33 }
 0x894   : > { %1614 = vst.msk [vmem:[%s328_s21] sm:$0xff] %vm1327_vm1, %v1612_v38 }
 0x895   : > { %v1613_v41 = vmul.f32 0.125, %v1610_v48 }
 0x897   : > { %1615 = vst.msk [vmem:[%s328_s21 + $0x8] sm:$0xff] %vm1327_vm1, %v1613_v41 }
 0x898   : > { %2207 = shalt.err (!%p2204_p7)
}
 0x899   : > { %s2208_s10 = scalar_lea.hbm %s2822_s17, 256  ;;  %s2212_s18 = scalar_lea.hbm %s2878_s8, 512 }
 0x89a   : > { %p2209_p8 = scmp.ne.s32.totalorder %s2822_s17, %s2208_s10  ;;  %p2213_p1 = scmp.lt.u32.totalorder %s2822_s17, %s2878_s8 }
 0x89b   : > { %p2214_p0 = scmp.lt.u32.totalorder %s2212_s18, %s2208_s10  ;;  %p2216_p6 = scmp.lt.u32.totalorder %s2208_s10, %s2822_s17 }
 0x89c   : > { %p2210_p11 = pnand %p2209_p8, %p2889_p9 }
 0x89d   : > { %p2215_p5 = por %p2214_p0, %p2213_p1 }
 0x89e   : > { %p2211_p13 = pneg %p2210_p11 }
 0x89f   : > { %p2217_p10 = por %p2216_p6, %p2215_p5 }
 0x8a1   : > { %p2218_p12 = pnand %p2217_p10, %p2211_p13 }
 0x8a3   : > { %2221 = shalt.err (!%p2218_p12)
}
 0x8a4   : > { %s2266_s20 = smov 128   ;;  %s2267_s23 = smov 8  }
 0x8a5   : > { %2068 = dma.vmem_to_hbm [thread:$0]  (%p2889_p9), %s2824_s22, 256, %s2822_s17, %s2829_s9, %s2266_s20, %s2266_s20, %s2267_s23  }
 0x8a6 PF: > { %p2080_p2 = scmp.ge.s32.totalorder %s2260_s30, 2  ;;  %s1645_s24 = sand.u32 1, %s2248_s27  }
 0x8a7   : > { %p2890_p3 = scmp.ne.s32.totalorder %s2883_s16, 0  ;;  %s1646_s25 = scalar_lea.sflag [#allocation5], %s1645_s24 }
 0x8a9   : > { %p2075_p4 = pnand %p2080_p2, %p2890_p3 }
 0x8ab   : > { %2243 = dma.done.wait (!%p2075_p4), %s1646_s25, 256  }
 0x8ac   : > { %2245 = vsyncadd (!%p2075_p4), %s1646_s25, 4294967040  ;;  %p19_p7 = scmp.ge.s32.totalorder %s2338_s11, 4   ;;  %s2891_s27 = smov %s2252_s28 }
 0x8ad   : > { %s2892_s28 = smov %s2256_s29  ;;  %s2893_s29 = smov %s2349_s14 }
 0x8ae   : > { %s2894_s30 = smov %s2338_s11  ;;  %21 = sbr.rel (!%p19_p7) target bundleno = 4 (0x4), region = 95 }
 0x8b5   :  { %1651 = vsyncpa [#allocation4], 1 }
 0x8b6   :  { %1653 = vsyncpa [#allocation4 + $0x1], 1 }
 0x8b7   :  { %1654 = vsyncpa [#allocation5], 1 }
 0x8b8   :  { %1656 = vsyncpa [#allocation5 + $0x1], 1 }

</bundles_post_ra>
